<compile_context>
chip_gen: v6e
topology: v6e:2x2x1
jax: 0.10.0
libtpu: 0.0.40
codegen_flags: <defaults>
</compile_context>

<pallas_src>
import functools

import jax
import jax.numpy as jnp
from jax import lax
from jax.experimental import pallas as pl
from jax.experimental.pallas import tpu as pltpu


def _round_up(a, m):
    return (a + m - 1) // m * m


def _sigmoid(x):
    # Exact: sigmoid(x) == 0.5 * tanh(0.5 * x) + 0.5  (1 EUP op, VPU does the rest).
    return 0.5 * jnp.tanh(0.5 * x) + 0.5


def _lstm_kernel(x_ref, wih_ref, whh_ref, b_ref, wfc_ref, bfc_ref,
                 out_ref, gx_ref, h_ref, c_ref, *, seq_len, t_chunk, unroll):
    """One time-chunk of the LSTM forward.

    x_ref   : (t_chunk*BP, I)  bf16  time-major chunk, batch padded to BP
    wih_ref : (I, 4*HP)        bf16  W_ih^T, gate blocks lane-aligned
    whh_ref : (HP, 4*HP)       bf16  W_hh^T, gate blocks lane-aligned
    b_ref   : (1, 4*HP)        f32   b_ih + b_hh
    wfc_ref : (HP, 128)        f32   W_fc^T padded lane-dense
    bfc_ref : (1, 128)         f32   b_fc padded
    out_ref : (BP, 128)        f32   result tile (resident across chunks)
    gx_ref  : (t_chunk*BP, 4*HP) f32 VMEM scratch: hoisted input projection
    h_ref/c_ref : (BP, HP)     f32   recurrent state, persists across chunks
    """
    BP = out_ref.shape[0]
    HP = h_ref.shape[1]

    chunk = pl.program_id(0)
    n_chunks = pl.num_programs(0)

    @pl.when(chunk == 0)
    def _():
        h_ref[...] = jnp.zeros_like(h_ref)
        c_ref[...] = jnp.zeros_like(c_ref)

    # Hoisted input projection + bias for the whole chunk: one bf16 MXU matmul.
    gx_ref[...] = (
        jnp.dot(x_ref[...], wih_ref[...], preferred_element_type=jnp.float32)
        + b_ref[...])

    def step(t, carry):
        h, c_s = carry
        row = pl.multiple_of(t * BP, BP)
        gx = gx_ref[pl.ds(row, BP), :]                     # (BP, 4*HP)
        h_b = h.astype(jnp.bfloat16)
        # PyTorch gate order i, f, g, o; one lane-aligned 128-col slab per gate.
        # Per-gate matmuls let EUP activations overlap the next gate's MXU work.
        i_g = _sigmoid(gx[:, 0 * HP:1 * HP]
                       + jnp.dot(h_b, whh_ref[:, 0 * HP:1 * HP],
                                 preferred_element_type=jnp.float32))
        f_g = _sigmoid(gx[:, 1 * HP:2 * HP]
                       + jnp.dot(h_b, whh_ref[:, 1 * HP:2 * HP],
                                 preferred_element_type=jnp.float32))
        g_g = jnp.tanh(gx[:, 2 * HP:3 * HP]
                       + jnp.dot(h_b, whh_ref[:, 2 * HP:3 * HP],
                                 preferred_element_type=jnp.float32))
        o_g = _sigmoid(gx[:, 3 * HP:4 * HP]
                       + jnp.dot(h_b, whh_ref[:, 3 * HP:4 * HP],
                                 preferred_element_type=jnp.float32))
        c_new = f_g * c_s + i_g * g_g
        h_new = o_g * jnp.tanh(c_new)
        if seq_len % t_chunk != 0:
            # Only traced when the last chunk has padded (zero) time steps.
            valid = (chunk * t_chunk + t) < seq_len
            h_new = jnp.where(valid, h_new, h)
            c_new = jnp.where(valid, c_new, c_s)
        return h_new, c_new

    h_fin, c_fin = lax.fori_loop(0, t_chunk, step, (h_ref[...], c_ref[...]),
                                 unroll=unroll)
    h_ref[...] = h_fin
    c_ref[...] = c_fin

    @pl.when(chunk == n_chunks - 1)
    def _():
        # Dropout is identity at inference; apply the fc head (lane-dense tile).
        out_ref[...] = (
            jnp.dot(h_fin, wfc_ref[...], preferred_element_type=jnp.float32)
            + bfc_ref[...]).astype(out_ref.dtype)


def simple_lstm_forward(x, params, *, t_chunk=128):
    """x: (B, T, input_size) float32.  Returns (B, 1) float32."""
    B, T, I = x.shape
    H = params["w_hh"].shape[0] // 4

    BP = _round_up(max(B, 8), 8)        # sublane-aligned batch
    HP = _round_up(H, 128)              # lane-aligned gate width
    G = 4 * HP
    TCHUNK = min(t_chunk, T)            # fixed-size time chunk (caps VMEM)
    n_chunks = -(-T // TCHUNK)
    T_pad = n_chunks * TCHUNK
    UNROLL = min(8, TCHUNK)

    f32, bf16 = jnp.float32, jnp.bfloat16

    # Gate-blocked, padded, pre-transposed weights (zero padding is LSTM-neutral).
    w_ih = params["w_ih"].astype(f32).reshape(4, H, I)
    w_ih = jnp.pad(w_ih, ((0, 0), (0, HP - H), (0, 0)))
    w_ih_t = jnp.transpose(w_ih, (2, 0, 1)).reshape(I, G).astype(bf16)

    w_hh = params["w_hh"].astype(f32).reshape(4, H, H)
    w_hh = jnp.pad(w_hh, ((0, 0), (0, HP - H), (0, 0)))
    w_hh_t = jnp.transpose(w_hh, (2, 0, 1)).reshape(H, G)
    w_hh_t = jnp.pad(w_hh_t, ((0, HP - H), (0, 0))).astype(bf16)

    bias = (params["b_ih"] + params["b_hh"]).astype(f32).reshape(4, H)
    b_pad = jnp.pad(bias, ((0, 0), (0, HP - H))).reshape(1, G)

    w_fc_t = jnp.pad(params["w_fc"].astype(f32).T, ((0, HP - H), (0, 127)))
    b_fc_p = jnp.pad(params["b_fc"].astype(f32).reshape(1, 1), ((0, 0), (0, 127)))

    # (B, T, I) -> time-major, batch/time padded, flattened, bf16.
    x_t = jnp.transpose(x.astype(f32), (1, 0, 2))                   # (T, B, I)
    x_t = jnp.pad(x_t, ((0, T_pad - T), (0, BP - B), (0, 0)))       # (T_pad, BP, I)
    x2d = x_t.reshape(T_pad * BP, I).astype(bf16)

    # VMEM budget: double-buffered x chunk + gx scratch + weights + states + out.
    lane_i = _round_up(I, 128)
    vmem_bytes = (
        2 * TCHUNK * BP * lane_i * 2          # x chunk (bf16), double-buffered
        + TCHUNK * BP * G * 4                 # gx scratch (f32)
        + _round_up(I, 16) * G * 2            # W_ih^T (bf16)
        + HP * G * 2                          # W_hh^T (bf16)
        + 8 * G * 4 + 8 * 128 * 4             # biases (sublane-padded)
        + 2 * BP * HP * 4                     # h, c state
        + 2 * BP * 128 * 4                    # out tile
        + HP * 128 * 4                        # W_fc^T
    )
    vmem_limit = int(min(max(2 * vmem_bytes, 8 * 1024 * 1024), 64 * 1024 * 1024))

    kernel = functools.partial(_lstm_kernel, seq_len=T, t_chunk=TCHUNK,
                               unroll=UNROLL)

    out = pl.pallas_call(
        kernel,
        out_shape=jax.ShapeDtypeStruct((BP, 128), jnp.float32),
        grid_spec=pltpu.PrefetchScalarGridSpec(
            num_scalar_prefetch=0,
            grid=(n_chunks,),
            in_specs=[
                pl.BlockSpec((TCHUNK * BP, I), lambda c: (c, 0)),   # x chunk
                pl.BlockSpec((I, G), lambda c: (0, 0)),             # W_ih^T
                pl.BlockSpec((HP, G), lambda c: (0, 0)),            # W_hh^T
                pl.BlockSpec((1, G), lambda c: (0, 0)),             # bias
                pl.BlockSpec((HP, 128), lambda c: (0, 0)),          # W_fc^T
                pl.BlockSpec((1, 128), lambda c: (0, 0)),           # b_fc
            ],
            out_specs=pl.BlockSpec((BP, 128), lambda c: (0, 0)),
            scratch_shapes=[
                pltpu.VMEM((TCHUNK * BP, G), jnp.float32),          # gx chunk
                pltpu.VMEM((BP, HP), jnp.float32),                  # h state
                pltpu.VMEM((BP, HP), jnp.float32),                  # c state
            ],
        ),
        compiler_params=pltpu.CompilerParams(
            dimension_semantics=("arbitrary",),
            vmem_limit_bytes=vmem_limit,
        ),
    )(x2d, w_ih_t, w_hh_t, b_pad, w_fc_t, b_fc_p)

    return out[:B, :1]


def init_params(key, input_size, hidden_size):
    ks = jax.random.split(key, 6)
    scale = 1.0 / jnp.sqrt(hidden_size)
    return {
        "w_ih": jax.random.uniform(ks[0], (4 * hidden_size, input_size),
                                   jnp.float32, -scale, scale),
        "w_hh": jax.random.uniform(ks[1], (4 * hidden_size, hidden_size),
                                   jnp.float32, -scale, scale),
        "b_ih": jax.random.uniform(ks[2], (4 * hidden_size,),
                                   jnp.float32, -scale, scale),
        "b_hh": jax.random.uniform(ks[3], (4 * hidden_size,),
                                   jnp.float32, -scale, scale),
        "w_fc": jax.random.uniform(ks[4], (1, hidden_size),
                                   jnp.float32, -scale, scale),
        "b_fc": jax.random.uniform(ks[5], (1,),
                                   jnp.float32, -scale, scale),
    }


def _reference_forward(x, params):
    """Pure-JAX f32 reference (matches torch.nn.LSTM semantics, eval-mode dropout)."""
    B, T, I = x.shape
    H = params["w_hh"].shape[0] // 4
    h = jnp.zeros((B, H), jnp.float32)
    c = jnp.zeros((B, H), jnp.float32)
    b = params["b_ih"] + params["b_hh"]
    for t in range(T):
        gates = x[:, t, :] @ params["w_ih"].T + h @ params["w_hh"].T + b
        i_g = jax.nn.sigmoid(gates[:, 0 * H:1 * H])
        f_g = jax.nn.sigmoid(gates[:, 1 * H:2 * H])
        g_g = jnp.tanh(gates[:, 2 * H:3 * H])
        o_g = jax.nn.sigmoid(gates[:, 3 * H:4 * H])
        c = f_g * c + i_g * g_g
        h = o_g * jnp.tanh(c)
    return h @ params["w_fc"].T + params["b_fc"]


if __name__ == "__main__":
    B, T, INPUT, HIDDEN = 2, 8, 21, 64
    key = jax.random.PRNGKey(0)
    k_x, k_p = jax.random.split(key)
    x = jax.random.normal(k_x, (B, T, INPUT), jnp.float32)
    params = init_params(k_p, INPUT, HIDDEN)

    out = jax.block_until_ready(simple_lstm_forward(x, params))
    ref = _reference_forward(x, params)

    assert out.shape == (B, 1), out.shape
    # bf16 MXU operands (f32 accumulate) vs. the pure-f32 reference -> 1e-2 tol.
    assert jnp.allclose(out, ref, atol=1e-2, rtol=1e-2), (out, ref)

    print("KERNEL_OK")
</pallas_src>

<mosaic_0001>
module attributes {stable_mosaic.version = 11 : i64} {
  func.func @_lstm_kernel(%arg0: i32, %arg1: memref<64x21xbf16, #tpu.memory_space<vmem>>, %arg2: memref<21x512xbf16, #tpu.memory_space<vmem>>, %arg3: memref<128x512xbf16, #tpu.memory_space<vmem>>, %arg4: memref<1x512xf32, #tpu.memory_space<vmem>>, %arg5: memref<128x128xf32, #tpu.memory_space<vmem>>, %arg6: memref<1x128xf32, #tpu.memory_space<vmem>>, %arg7: memref<8x128xf32, #tpu.memory_space<vmem>>, %arg8: memref<64x512xf32, #tpu.memory_space<vmem>>, %arg9: memref<8x128xf32, #tpu.memory_space<vmem>>, %arg10: memref<8x128xf32, #tpu.memory_space<vmem>>) attributes {dimension_semantics = [#tpu.dimension_semantics<arbitrary>], iteration_bounds = array<i64: 1>, scalar_prefetch = 0 : i64, scratch_operands = 3 : i64, tpu.core_type = #tpu.core_type<tc>, window_params = [{transform_indices = @transform_0, window_bounds = array<i64: 64, 21>}, {pipeline_mode = #tpu.pipeline_mode<synchronous>, transform_indices = @transform_1, window_bounds = array<i64: 21, 512>}, {pipeline_mode = #tpu.pipeline_mode<synchronous>, transform_indices = @transform_2, window_bounds = array<i64: 128, 512>}, {pipeline_mode = #tpu.pipeline_mode<synchronous>, transform_indices = @transform_3, window_bounds = array<i64: 1, 512>}, {pipeline_mode = #tpu.pipeline_mode<synchronous>, transform_indices = @transform_4, window_bounds = array<i64: 128, 128>}, {pipeline_mode = #tpu.pipeline_mode<synchronous>, transform_indices = @transform_5, window_bounds = array<i64: 1, 128>}, {pipeline_mode = #tpu.pipeline_mode<synchronous>, transform_indices = @transform_6, window_bounds = array<i64: 8, 128>}]} {
    %c0_i32 = arith.constant 0 : i32
    %0 = arith.cmpi eq, %arg0, %c0_i32 : i32
    %1 = arith.extui %0 : i1 to i32
    %c0_i32_0 = arith.constant 0 : i32
    %2 = arith.cmpi ne, %1, %c0_i32_0 : i32
    scf.if %2 {
      %cst_200 = arith.constant 0.000000e+00 : f32
      %401 = vector.broadcast %cst_200 : f32 to vector<8x128xf32>
      %c0_201 = arith.constant 0 : index
      %c0_202 = arith.constant 0 : index
      %402 = vector.load %arg9[%c0_201, %c0_202] : memref<8x128xf32, #tpu.memory_space<vmem>>, vector<8x128xf32>
      tpu.vector_store %arg9[%c0_201, %c0_202], %401 {strides = array<i32>} : memref<8x128xf32, #tpu.memory_space<vmem>>, vector<8x128xf32>,
      %cst_203 = arith.constant 0.000000e+00 : f32
      %403 = vector.broadcast %cst_203 : f32 to vector<8x128xf32>
      %c0_204 = arith.constant 0 : index
      %c0_205 = arith.constant 0 : index
      %404 = vector.load %arg10[%c0_204, %c0_205] : memref<8x128xf32, #tpu.memory_space<vmem>>, vector<8x128xf32>
      tpu.vector_store %arg10[%c0_204, %c0_205], %403 {strides = array<i32>} : memref<8x128xf32, #tpu.memory_space<vmem>>, vector<8x128xf32>,
    } else {
    }
    %c0 = arith.constant 0 : index
    %c0_1 = arith.constant 0 : index
    %3 = vector.load %arg1[%c0, %c0_1] : memref<64x21xbf16, #tpu.memory_space<vmem>>, vector<64x21xbf16>
    %c0_2 = arith.constant 0 : index
    %c0_3 = arith.constant 0 : index
    %4 = vector.load %arg2[%c0_2, %c0_3] : memref<21x512xbf16, #tpu.memory_space<vmem>>, vector<21x512xbf16>
    %cst = arith.constant dense<0.000000e+00> : vector<64x512xf32>
    %5 = tpu.matmul %3, %4, %cst {dimension_numbers = #tpu.dot_dimension_numbers<[1], [0], [0], [1], [0, 0, 1, 1], [], []>} : vector<64x21xbf16>, vector<21x512xbf16>, vector<64x512xf32> -> vector<64x512xf32>
    %c0_4 = arith.constant 0 : index
    %c0_5 = arith.constant 0 : index
    %6 = vector.load %arg4[%c0_4, %c0_5] : memref<1x512xf32, #tpu.memory_space<vmem>>, vector<1x512xf32>
    %7 = vector.broadcast %6 : vector<1x512xf32> to vector<64x512xf32>
    %8 = arith.addf %5, %7 : vector<64x512xf32>
    %c0_6 = arith.constant 0 : index
    %c0_7 = arith.constant 0 : index
    %9 = vector.load %arg8[%c0_6, %c0_7] : memref<64x512xf32, #tpu.memory_space<vmem>>, vector<64x512xf32>
    tpu.vector_store %arg8[%c0_6, %c0_7], %8 {strides = array<i32>} : memref<64x512xf32, #tpu.memory_space<vmem>>, vector<64x512xf32>,
    %c0_8 = arith.constant 0 : index
    %c0_9 = arith.constant 0 : index
    %10 = vector.load %arg9[%c0_8, %c0_9] : memref<8x128xf32, #tpu.memory_space<vmem>>, vector<8x128xf32>
    %c0_10 = arith.constant 0 : index
    %c0_11 = arith.constant 0 : index
    %11 = vector.load %arg10[%c0_10, %c0_11] : memref<8x128xf32, #tpu.memory_space<vmem>>, vector<8x128xf32>
    %c0_i32_12 = arith.constant 0 : i32
    %c8_i32 = arith.constant 8 : i32
    %12 = arith.muli %c0_i32_12, %c8_i32 : i32
    %13 = tpu.assume_multiple %12, 8 : i32
    %14 = arith.index_cast %13 : i32 to index
    %c0_13 = arith.constant 0 : index
    %15 = vector.load %arg8[%14, %c0_13] : memref<64x512xf32, #tpu.memory_space<vmem>>, vector<8x512xf32>
    %16 = arith.truncf %10 : vector<8x128xf32> to vector<8x128xbf16>
    %17 = vector.extract_strided_slice %15 {offsets = [0, 0], sizes = [8, 128], strides = [1, 1]} : vector<8x512xf32> to vector<8x128xf32>
    %c0_14 = arith.constant 0 : index
    %c0_15 = arith.constant 0 : index
    %18 = vector.load %arg3[%c0_14, %c0_15] : memref<128x512xbf16, #tpu.memory_space<vmem>>, vector<128x128xbf16>
    %cst_16 = arith.constant dense<0.000000e+00> : vector<8x128xf32>
    %19 = tpu.matmul %16, %18, %cst_16 {dimension_numbers = #tpu.dot_dimension_numbers<[1], [0], [0], [1], [0, 0, 1, 1], [], []>} : vector<8x128xbf16>, vector<128x128xbf16>, vector<8x128xf32> -> vector<8x128xf32>
    %20 = arith.addf %17, %19 : vector<8x128xf32>
    %cst_17 = arith.constant 5.000000e-01 : f32
    %21 = vector.broadcast %cst_17 : f32 to vector<8x128xf32>
    %22 = arith.mulf %21, %20 : vector<8x128xf32>
    %23 = math.tanh %22 : vector<8x128xf32>
    %cst_18 = arith.constant 5.000000e-01 : f32
    %24 = vector.broadcast %cst_18 : f32 to vector<8x128xf32>
    %25 = arith.mulf %24, %23 : vector<8x128xf32>
    %cst_19 = arith.constant 5.000000e-01 : f32
    %26 = vector.broadcast %cst_19 : f32 to vector<8x128xf32>
    %27 = arith.addf %25, %26 : vector<8x128xf32>
    %28 = vector.extract_strided_slice %15 {offsets = [0, 128], sizes = [8, 128], strides = [1, 1]} : vector<8x512xf32> to vector<8x128xf32>
    %c0_20 = arith.constant 0 : index
    %c128 = arith.constant 128 : index
    %29 = vector.load %arg3[%c0_20, %c128] : memref<128x512xbf16, #tpu.memory_space<vmem>>, vector<128x128xbf16>
    %cst_21 = arith.constant dense<0.000000e+00> : vector<8x128xf32>
    %30 = tpu.matmul %16, %29, %cst_21 {dimension_numbers = #tpu.dot_dimension_numbers<[1], [0], [0], [1], [0, 0, 1, 1], [], []>} : vector<8x128xbf16>, vector<128x128xbf16>, vector<8x128xf32> -> vector<8x128xf32>
    %31 = arith.addf %28, %30 : vector<8x128xf32>
    %cst_22 = arith.constant 5.000000e-01 : f32
    %32 = vector.broadcast %cst_22 : f32 to vector<8x128xf32>
    %33 = arith.mulf %32, %31 : vector<8x128xf32>
    %34 = math.tanh %33 : vector<8x128xf32>
    %cst_23 = arith.constant 5.000000e-01 : f32
    %35 = vector.broadcast %cst_23 : f32 to vector<8x128xf32>
    %36 = arith.mulf %35, %34 : vector<8x128xf32>
    %cst_24 = arith.constant 5.000000e-01 : f32
    %37 = vector.broadcast %cst_24 : f32 to vector<8x128xf32>
    %38 = arith.addf %36, %37 : vector<8x128xf32>
    %39 = vector.extract_strided_slice %15 {offsets = [0, 256], sizes = [8, 128], strides = [1, 1]} : vector<8x512xf32> to vector<8x128xf32>
    %c0_25 = arith.constant 0 : index
    %c256 = arith.constant 256 : index
    %40 = vector.load %arg3[%c0_25, %c256] : memref<128x512xbf16, #tpu.memory_space<vmem>>, vector<128x128xbf16>
    %cst_26 = arith.constant dense<0.000000e+00> : vector<8x128xf32>
    %41 = tpu.matmul %16, %40, %cst_26 {dimension_numbers = #tpu.dot_dimension_numbers<[1], [0], [0], [1], [0, 0, 1, 1], [], []>} : vector<8x128xbf16>, vector<128x128xbf16>, vector<8x128xf32> -> vector<8x128xf32>
    %42 = arith.addf %39, %41 : vector<8x128xf32>
    %43 = math.tanh %42 : vector<8x128xf32>
    %44 = vector.extract_strided_slice %15 {offsets = [0, 384], sizes = [8, 128], strides = [1, 1]} : vector<8x512xf32> to vector<8x128xf32>
    %c0_27 = arith.constant 0 : index
    %c384 = arith.constant 384 : index
    %45 = vector.load %arg3[%c0_27, %c384] : memref<128x512xbf16, #tpu.memory_space<vmem>>, vector<128x128xbf16>
    %cst_28 = arith.constant dense<0.000000e+00> : vector<8x128xf32>
    %46 = tpu.matmul %16, %45, %cst_28 {dimension_numbers = #tpu.dot_dimension_numbers<[1], [0], [0], [1], [0, 0, 1, 1], [], []>} : vector<8x128xbf16>, vector<128x128xbf16>, vector<8x128xf32> -> vector<8x128xf32>
    %47 = arith.addf %44, %46 : vector<8x128xf32>
    %cst_29 = arith.constant 5.000000e-01 : f32
    %48 = vector.broadcast %cst_29 : f32 to vector<8x128xf32>
    %49 = arith.mulf %48, %47 : vector<8x128xf32>
    %50 = math.tanh %49 : vector<8x128xf32>
    %cst_30 = arith.constant 5.000000e-01 : f32
    %51 = vector.broadcast %cst_30 : f32 to vector<8x128xf32>
    %52 = arith.mulf %51, %50 : vector<8x128xf32>
    %cst_31 = arith.constant 5.000000e-01 : f32
    %53 = vector.broadcast %cst_31 : f32 to vector<8x128xf32>
    %54 = arith.addf %52, %53 : vector<8x128xf32>
    %55 = arith.mulf %38, %11 : vector<8x128xf32>
    %56 = arith.mulf %27, %43 : vector<8x128xf32>
    %57 = arith.addf %55, %56 : vector<8x128xf32>
    %58 = math.tanh %57 : vector<8x128xf32>
    %59 = arith.mulf %54, %58 : vector<8x128xf32>
    %c1_i32 = arith.constant 1 : i32
    %c8_i32_32 = arith.constant 8 : i32
    %60 = arith.muli %c1_i32, %c8_i32_32 : i32
    %61 = tpu.assume_multiple %60, 8 : i32
    %62 = arith.index_cast %61 : i32 to index
    %c0_33 = arith.constant 0 : index
    %63 = vector.load %arg8[%62, %c0_33] : memref<64x512xf32, #tpu.memory_space<vmem>>, vector<8x512xf32>
    %64 = arith.truncf %59 : vector<8x128xf32> to vector<8x128xbf16>
    %65 = vector.extract_strided_slice %63 {offsets = [0, 0], sizes = [8, 128], strides = [1, 1]} : vector<8x512xf32> to vector<8x128xf32>
    %c0_34 = arith.constant 0 : index
    %c0_35 = arith.constant 0 : index
    %66 = vector.load %arg3[%c0_34, %c0_35] : memref<128x512xbf16, #tpu.memory_space<vmem>>, vector<128x128xbf16>
    %cst_36 = arith.constant dense<0.000000e+00> : vector<8x128xf32>
    %67 = tpu.matmul %64, %66, %cst_36 {dimension_numbers = #tpu.dot_dimension_numbers<[1], [0], [0], [1], [0, 0, 1, 1], [], []>} : vector<8x128xbf16>, vector<128x128xbf16>, vector<8x128xf32> -> vector<8x128xf32>
    %68 = arith.addf %65, %67 : vector<8x128xf32>
    %cst_37 = arith.constant 5.000000e-01 : f32
    %69 = vector.broadcast %cst_37 : f32 to vector<8x128xf32>
    %70 = arith.mulf %69, %68 : vector<8x128xf32>
    %71 = math.tanh %70 : vector<8x128xf32>
    %cst_38 = arith.constant 5.000000e-01 : f32
    %72 = vector.broadcast %cst_38 : f32 to vector<8x128xf32>
    %73 = arith.mulf %72, %71 : vector<8x128xf32>
    %cst_39 = arith.constant 5.000000e-01 : f32
    %74 = vector.broadcast %cst_39 : f32 to vector<8x128xf32>
    %75 = arith.addf %73, %74 : vector<8x128xf32>
    %76 = vector.extract_strided_slice %63 {offsets = [0, 128], sizes = [8, 128], strides = [1, 1]} : vector<8x512xf32> to vector<8x128xf32>
    %c0_40 = arith.constant 0 : index
    %c128_41 = arith.constant 128 : index
    %77 = vector.load %arg3[%c0_40, %c128_41] : memref<128x512xbf16, #tpu.memory_space<vmem>>, vector<128x128xbf16>
    %cst_42 = arith.constant dense<0.000000e+00> : vector<8x128xf32>
    %78 = tpu.matmul %64, %77, %cst_42 {dimension_numbers = #tpu.dot_dimension_numbers<[1], [0], [0], [1], [0, 0, 1, 1], [], []>} : vector<8x128xbf16>, vector<128x128xbf16>, vector<8x128xf32> -> vector<8x128xf32>
    %79 = arith.addf %76, %78 : vector<8x128xf32>
    %cst_43 = arith.constant 5.000000e-01 : f32
    %80 = vector.broadcast %cst_43 : f32 to vector<8x128xf32>
    %81 = arith.mulf %80, %79 : vector<8x128xf32>
    %82 = math.tanh %81 : vector<8x128xf32>
    %cst_44 = arith.constant 5.000000e-01 : f32
    %83 = vector.broadcast %cst_44 : f32 to vector<8x128xf32>
    %84 = arith.mulf %83, %82 : vector<8x128xf32>
    %cst_45 = arith.constant 5.000000e-01 : f32
    %85 = vector.broadcast %cst_45 : f32 to vector<8x128xf32>
    %86 = arith.addf %84, %85 : vector<8x128xf32>
    %87 = vector.extract_strided_slice %63 {offsets = [0, 256], sizes = [8, 128], strides = [1, 1]} : vector<8x512xf32> to vector<8x128xf32>
    %c0_46 = arith.constant 0 : index
    %c256_47 = arith.constant 256 : index
    %88 = vector.load %arg3[%c0_46, %c256_47] : memref<128x512xbf16, #tpu.memory_space<vmem>>, vector<128x128xbf16>
    %cst_48 = arith.constant dense<0.000000e+00> : vector<8x128xf32>
    %89 = tpu.matmul %64, %88, %cst_48 {dimension_numbers = #tpu.dot_dimension_numbers<[1], [0], [0], [1], [0, 0, 1, 1], [], []>} : vector<8x128xbf16>, vector<128x128xbf16>, vector<8x128xf32> -> vector<8x128xf32>
    %90 = arith.addf %87, %89 : vector<8x128xf32>
    %91 = math.tanh %90 : vector<8x128xf32>
    %92 = vector.extract_strided_slice %63 {offsets = [0, 384], sizes = [8, 128], strides = [1, 1]} : vector<8x512xf32> to vector<8x128xf32>
    %c0_49 = arith.constant 0 : index
    %c384_50 = arith.constant 384 : index
    %93 = vector.load %arg3[%c0_49, %c384_50] : memref<128x512xbf16, #tpu.memory_space<vmem>>, vector<128x128xbf16>
    %cst_51 = arith.constant dense<0.000000e+00> : vector<8x128xf32>
    %94 = tpu.matmul %64, %93, %cst_51 {dimension_numbers = #tpu.dot_dimension_numbers<[1], [0], [0], [1], [0, 0, 1, 1], [], []>} : vector<8x128xbf16>, vector<128x128xbf16>, vector<8x128xf32> -> vector<8x128xf32>
    %95 = arith.addf %92, %94 : vector<8x128xf32>
    %cst_52 = arith.constant 5.000000e-01 : f32
    %96 = vector.broadcast %cst_52 : f32 to vector<8x128xf32>
    %97 = arith.mulf %96, %95 : vector<8x128xf32>
    %98 = math.tanh %97 : vector<8x128xf32>
    %cst_53 = arith.constant 5.000000e-01 : f32
    %99 = vector.broadcast %cst_53 : f32 to vector<8x128xf32>
    %100 = arith.mulf %99, %98 : vector<8x128xf32>
    %cst_54 = arith.constant 5.000000e-01 : f32
    %101 = vector.broadcast %cst_54 : f32 to vector<8x128xf32>
    %102 = arith.addf %100, %101 : vector<8x128xf32>
    %103 = arith.mulf %86, %57 : vector<8x128xf32>
    %104 = arith.mulf %75, %91 : vector<8x128xf32>
    %105 = arith.addf %103, %104 : vector<8x128xf32>
    %106 = math.tanh %105 : vector<8x128xf32>
    %107 = arith.mulf %102, %106 : vector<8x128xf32>
    %c2_i32 = arith.constant 2 : i32
    %c8_i32_55 = arith.constant 8 : i32
    %108 = arith.muli %c2_i32, %c8_i32_55 : i32
    %109 = tpu.assume_multiple %108, 8 : i32
    %110 = arith.index_cast %109 : i32 to index
    %c0_56 = arith.constant 0 : index
    %111 = vector.load %arg8[%110, %c0_56] : memref<64x512xf32, #tpu.memory_space<vmem>>, vector<8x512xf32>
    %112 = arith.truncf %107 : vector<8x128xf32> to vector<8x128xbf16>
    %113 = vector.extract_strided_slice %111 {offsets = [0, 0], sizes = [8, 128], strides = [1, 1]} : vector<8x512xf32> to vector<8x128xf32>
    %c0_57 = arith.constant 0 : index
    %c0_58 = arith.constant 0 : index
    %114 = vector.load %arg3[%c0_57, %c0_58] : memref<128x512xbf16, #tpu.memory_space<vmem>>, vector<128x128xbf16>
    %cst_59 = arith.constant dense<0.000000e+00> : vector<8x128xf32>
    %115 = tpu.matmul %112, %114, %cst_59 {dimension_numbers = #tpu.dot_dimension_numbers<[1], [0], [0], [1], [0, 0, 1, 1], [], []>} : vector<8x128xbf16>, vector<128x128xbf16>, vector<8x128xf32> -> vector<8x128xf32>
    %116 = arith.addf %113, %115 : vector<8x128xf32>
    %cst_60 = arith.constant 5.000000e-01 : f32
    %117 = vector.broadcast %cst_60 : f32 to vector<8x128xf32>
    %118 = arith.mulf %117, %116 : vector<8x128xf32>
    %119 = math.tanh %118 : vector<8x128xf32>
    %cst_61 = arith.constant 5.000000e-01 : f32
    %120 = vector.broadcast %cst_61 : f32 to vector<8x128xf32>
    %121 = arith.mulf %120, %119 : vector<8x128xf32>
    %cst_62 = arith.constant 5.000000e-01 : f32
    %122 = vector.broadcast %cst_62 : f32 to vector<8x128xf32>
    %123 = arith.addf %121, %122 : vector<8x128xf32>
    %124 = vector.extract_strided_slice %111 {offsets = [0, 128], sizes = [8, 128], strides = [1, 1]} : vector<8x512xf32> to vector<8x128xf32>
    %c0_63 = arith.constant 0 : index
    %c128_64 = arith.constant 128 : index
    %125 = vector.load %arg3[%c0_63, %c128_64] : memref<128x512xbf16, #tpu.memory_space<vmem>>, vector<128x128xbf16>
    %cst_65 = arith.constant dense<0.000000e+00> : vector<8x128xf32>
    %126 = tpu.matmul %112, %125, %cst_65 {dimension_numbers = #tpu.dot_dimension_numbers<[1], [0], [0], [1], [0, 0, 1, 1], [], []>} : vector<8x128xbf16>, vector<128x128xbf16>, vector<8x128xf32> -> vector<8x128xf32>
    %127 = arith.addf %124, %126 : vector<8x128xf32>
    %cst_66 = arith.constant 5.000000e-01 : f32
    %128 = vector.broadcast %cst_66 : f32 to vector<8x128xf32>
    %129 = arith.mulf %128, %127 : vector<8x128xf32>
    %130 = math.tanh %129 : vector<8x128xf32>
    %cst_67 = arith.constant 5.000000e-01 : f32
    %131 = vector.broadcast %cst_67 : f32 to vector<8x128xf32>
    %132 = arith.mulf %131, %130 : vector<8x128xf32>
    %cst_68 = arith.constant 5.000000e-01 : f32
    %133 = vector.broadcast %cst_68 : f32 to vector<8x128xf32>
    %134 = arith.addf %132, %133 : vector<8x128xf32>
    %135 = vector.extract_strided_slice %111 {offsets = [0, 256], sizes = [8, 128], strides = [1, 1]} : vector<8x512xf32> to vector<8x128xf32>
    %c0_69 = arith.constant 0 : index
    %c256_70 = arith.constant 256 : index
    %136 = vector.load %arg3[%c0_69, %c256_70] : memref<128x512xbf16, #tpu.memory_space<vmem>>, vector<128x128xbf16>
    %cst_71 = arith.constant dense<0.000000e+00> : vector<8x128xf32>
    %137 = tpu.matmul %112, %136, %cst_71 {dimension_numbers = #tpu.dot_dimension_numbers<[1], [0], [0], [1], [0, 0, 1, 1], [], []>} : vector<8x128xbf16>, vector<128x128xbf16>, vector<8x128xf32> -> vector<8x128xf32>
    %138 = arith.addf %135, %137 : vector<8x128xf32>
    %139 = math.tanh %138 : vector<8x128xf32>
    %140 = vector.extract_strided_slice %111 {offsets = [0, 384], sizes = [8, 128], strides = [1, 1]} : vector<8x512xf32> to vector<8x128xf32>
    %c0_72 = arith.constant 0 : index
    %c384_73 = arith.constant 384 : index
    %141 = vector.load %arg3[%c0_72, %c384_73] : memref<128x512xbf16, #tpu.memory_space<vmem>>, vector<128x128xbf16>
    %cst_74 = arith.constant dense<0.000000e+00> : vector<8x128xf32>
    %142 = tpu.matmul %112, %141, %cst_74 {dimension_numbers = #tpu.dot_dimension_numbers<[1], [0], [0], [1], [0, 0, 1, 1], [], []>} : vector<8x128xbf16>, vector<128x128xbf16>, vector<8x128xf32> -> vector<8x128xf32>
    %143 = arith.addf %140, %142 : vector<8x128xf32>
    %cst_75 = arith.constant 5.000000e-01 : f32
    %144 = vector.broadcast %cst_75 : f32 to vector<8x128xf32>
    %145 = arith.mulf %144, %143 : vector<8x128xf32>
    %146 = math.tanh %145 : vector<8x128xf32>
    %cst_76 = arith.constant 5.000000e-01 : f32
    %147 = vector.broadcast %cst_76 : f32 to vector<8x128xf32>
    %148 = arith.mulf %147, %146 : vector<8x128xf32>
    %cst_77 = arith.constant 5.000000e-01 : f32
    %149 = vector.broadcast %cst_77 : f32 to vector<8x128xf32>
    %150 = arith.addf %148, %149 : vector<8x128xf32>
    %151 = arith.mulf %134, %105 : vector<8x128xf32>
    %152 = arith.mulf %123, %139 : vector<8x128xf32>
    %153 = arith.addf %151, %152 : vector<8x128xf32>
    %154 = math.tanh %153 : vector<8x128xf32>
    %155 = arith.mulf %150, %154 : vector<8x128xf32>
    %c3_i32 = arith.constant 3 : i32
    %c8_i32_78 = arith.constant 8 : i32
    %156 = arith.muli %c3_i32, %c8_i32_78 : i32
    %157 = tpu.assume_multiple %156, 8 : i32
    %158 = arith.index_cast %157 : i32 to index
    %c0_79 = arith.constant 0 : index
    %159 = vector.load %arg8[%158, %c0_79] : memref<64x512xf32, #tpu.memory_space<vmem>>, vector<8x512xf32>
    %160 = arith.truncf %155 : vector<8x128xf32> to vector<8x128xbf16>
    %161 = vector.extract_strided_slice %159 {offsets = [0, 0], sizes = [8, 128], strides = [1, 1]} : vector<8x512xf32> to vector<8x128xf32>
    %c0_80 = arith.constant 0 : index
    %c0_81 = arith.constant 0 : index
    %162 = vector.load %arg3[%c0_80, %c0_81] : memref<128x512xbf16, #tpu.memory_space<vmem>>, vector<128x128xbf16>
    %cst_82 = arith.constant dense<0.000000e+00> : vector<8x128xf32>
    %163 = tpu.matmul %160, %162, %cst_82 {dimension_numbers = #tpu.dot_dimension_numbers<[1], [0], [0], [1], [0, 0, 1, 1], [], []>} : vector<8x128xbf16>, vector<128x128xbf16>, vector<8x128xf32> -> vector<8x128xf32>
    %164 = arith.addf %161, %163 : vector<8x128xf32>
    %cst_83 = arith.constant 5.000000e-01 : f32
    %165 = vector.broadcast %cst_83 : f32 to vector<8x128xf32>
    %166 = arith.mulf %165, %164 : vector<8x128xf32>
    %167 = math.tanh %166 : vector<8x128xf32>
    %cst_84 = arith.constant 5.000000e-01 : f32
    %168 = vector.broadcast %cst_84 : f32 to vector<8x128xf32>
    %169 = arith.mulf %168, %167 : vector<8x128xf32>
    %cst_85 = arith.constant 5.000000e-01 : f32
    %170 = vector.broadcast %cst_85 : f32 to vector<8x128xf32>
    %171 = arith.addf %169, %170 : vector<8x128xf32>
    %172 = vector.extract_strided_slice %159 {offsets = [0, 128], sizes = [8, 128], strides = [1, 1]} : vector<8x512xf32> to vector<8x128xf32>
    %c0_86 = arith.constant 0 : index
    %c128_87 = arith.constant 128 : index
    %173 = vector.load %arg3[%c0_86, %c128_87] : memref<128x512xbf16, #tpu.memory_space<vmem>>, vector<128x128xbf16>
    %cst_88 = arith.constant dense<0.000000e+00> : vector<8x128xf32>
    %174 = tpu.matmul %160, %173, %cst_88 {dimension_numbers = #tpu.dot_dimension_numbers<[1], [0], [0], [1], [0, 0, 1, 1], [], []>} : vector<8x128xbf16>, vector<128x128xbf16>, vector<8x128xf32> -> vector<8x128xf32>
    %175 = arith.addf %172, %174 : vector<8x128xf32>
    %cst_89 = arith.constant 5.000000e-01 : f32
    %176 = vector.broadcast %cst_89 : f32 to vector<8x128xf32>
    %177 = arith.mulf %176, %175 : vector<8x128xf32>
    %178 = math.tanh %177 : vector<8x128xf32>
    %cst_90 = arith.constant 5.000000e-01 : f32
    %179 = vector.broadcast %cst_90 : f32 to vector<8x128xf32>
    %180 = arith.mulf %179, %178 : vector<8x128xf32>
    %cst_91 = arith.constant 5.000000e-01 : f32
    %181 = vector.broadcast %cst_91 : f32 to vector<8x128xf32>
    %182 = arith.addf %180, %181 : vector<8x128xf32>
    %183 = vector.extract_strided_slice %159 {offsets = [0, 256], sizes = [8, 128], strides = [1, 1]} : vector<8x512xf32> to vector<8x128xf32>
    %c0_92 = arith.constant 0 : index
    %c256_93 = arith.constant 256 : index
    %184 = vector.load %arg3[%c0_92, %c256_93] : memref<128x512xbf16, #tpu.memory_space<vmem>>, vector<128x128xbf16>
    %cst_94 = arith.constant dense<0.000000e+00> : vector<8x128xf32>
    %185 = tpu.matmul %160, %184, %cst_94 {dimension_numbers = #tpu.dot_dimension_numbers<[1], [0], [0], [1], [0, 0, 1, 1], [], []>} : vector<8x128xbf16>, vector<128x128xbf16>, vector<8x128xf32> -> vector<8x128xf32>
    %186 = arith.addf %183, %185 : vector<8x128xf32>
    %187 = math.tanh %186 : vector<8x128xf32>
    %188 = vector.extract_strided_slice %159 {offsets = [0, 384], sizes = [8, 128], strides = [1, 1]} : vector<8x512xf32> to vector<8x128xf32>
    %c0_95 = arith.constant 0 : index
    %c384_96 = arith.constant 384 : index
    %189 = vector.load %arg3[%c0_95, %c384_96] : memref<128x512xbf16, #tpu.memory_space<vmem>>, vector<128x128xbf16>
    %cst_97 = arith.constant dense<0.000000e+00> : vector<8x128xf32>
    %190 = tpu.matmul %160, %189, %cst_97 {dimension_numbers = #tpu.dot_dimension_numbers<[1], [0], [0], [1], [0, 0, 1, 1], [], []>} : vector<8x128xbf16>, vector<128x128xbf16>, vector<8x128xf32> -> vector<8x128xf32>
    %191 = arith.addf %188, %190 : vector<8x128xf32>
    %cst_98 = arith.constant 5.000000e-01 : f32
    %192 = vector.broadcast %cst_98 : f32 to vector<8x128xf32>
    %193 = arith.mulf %192, %191 : vector<8x128xf32>
    %194 = math.tanh %193 : vector<8x128xf32>
    %cst_99 = arith.constant 5.000000e-01 : f32
    %195 = vector.broadcast %cst_99 : f32 to vector<8x128xf32>
    %196 = arith.mulf %195, %194 : vector<8x128xf32>
    %cst_100 = arith.constant 5.000000e-01 : f32
    %197 = vector.broadcast %cst_100 : f32 to vector<8x128xf32>
    %198 = arith.addf %196, %197 : vector<8x128xf32>
    %199 = arith.mulf %182, %153 : vector<8x128xf32>
    %200 = arith.mulf %171, %187 : vector<8x128xf32>
    %201 = arith.addf %199, %200 : vector<8x128xf32>
    %202 = math.tanh %201 : vector<8x128xf32>
    %203 = arith.mulf %198, %202 : vector<8x128xf32>
    %c4_i32 = arith.constant 4 : i32
    %c8_i32_101 = arith.constant 8 : i32
    %204 = arith.muli %c4_i32, %c8_i32_101 : i32
    %205 = tpu.assume_multiple %204, 8 : i32
    %206 = arith.index_cast %205 : i32 to index
    %c0_102 = arith.constant 0 : index
    %207 = vector.load %arg8[%206, %c0_102] : memref<64x512xf32, #tpu.memory_space<vmem>>, vector<8x512xf32>
    %208 = arith.truncf %203 : vector<8x128xf32> to vector<8x128xbf16>
    %209 = vector.extract_strided_slice %207 {offsets = [0, 0], sizes = [8, 128], strides = [1, 1]} : vector<8x512xf32> to vector<8x128xf32>
    %c0_103 = arith.constant 0 : index
    %c0_104 = arith.constant 0 : index
    %210 = vector.load %arg3[%c0_103, %c0_104] : memref<128x512xbf16, #tpu.memory_space<vmem>>, vector<128x128xbf16>
    %cst_105 = arith.constant dense<0.000000e+00> : vector<8x128xf32>
    %211 = tpu.matmul %208, %210, %cst_105 {dimension_numbers = #tpu.dot_dimension_numbers<[1], [0], [0], [1], [0, 0, 1, 1], [], []>} : vector<8x128xbf16>, vector<128x128xbf16>, vector<8x128xf32> -> vector<8x128xf32>
    %212 = arith.addf %209, %211 : vector<8x128xf32>
    %cst_106 = arith.constant 5.000000e-01 : f32
    %213 = vector.broadcast %cst_106 : f32 to vector<8x128xf32>
    %214 = arith.mulf %213, %212 : vector<8x128xf32>
    %215 = math.tanh %214 : vector<8x128xf32>
    %cst_107 = arith.constant 5.000000e-01 : f32
    %216 = vector.broadcast %cst_107 : f32 to vector<8x128xf32>
    %217 = arith.mulf %216, %215 : vector<8x128xf32>
    %cst_108 = arith.constant 5.000000e-01 : f32
    %218 = vector.broadcast %cst_108 : f32 to vector<8x128xf32>
    %219 = arith.addf %217, %218 : vector<8x128xf32>
    %220 = vector.extract_strided_slice %207 {offsets = [0, 128], sizes = [8, 128], strides = [1, 1]} : vector<8x512xf32> to vector<8x128xf32>
    %c0_109 = arith.constant 0 : index
    %c128_110 = arith.constant 128 : index
    %221 = vector.load %arg3[%c0_109, %c128_110] : memref<128x512xbf16, #tpu.memory_space<vmem>>, vector<128x128xbf16>
    %cst_111 = arith.constant dense<0.000000e+00> : vector<8x128xf32>
    %222 = tpu.matmul %208, %221, %cst_111 {dimension_numbers = #tpu.dot_dimension_numbers<[1], [0], [0], [1], [0, 0, 1, 1], [], []>} : vector<8x128xbf16>, vector<128x128xbf16>, vector<8x128xf32> -> vector<8x128xf32>
    %223 = arith.addf %220, %222 : vector<8x128xf32>
    %cst_112 = arith.constant 5.000000e-01 : f32
    %224 = vector.broadcast %cst_112 : f32 to vector<8x128xf32>
    %225 = arith.mulf %224, %223 : vector<8x128xf32>
    %226 = math.tanh %225 : vector<8x128xf32>
    %cst_113 = arith.constant 5.000000e-01 : f32
    %227 = vector.broadcast %cst_113 : f32 to vector<8x128xf32>
    %228 = arith.mulf %227, %226 : vector<8x128xf32>
    %cst_114 = arith.constant 5.000000e-01 : f32
    %229 = vector.broadcast %cst_114 : f32 to vector<8x128xf32>
    %230 = arith.addf %228, %229 : vector<8x128xf32>
    %231 = vector.extract_strided_slice %207 {offsets = [0, 256], sizes = [8, 128], strides = [1, 1]} : vector<8x512xf32> to vector<8x128xf32>
    %c0_115 = arith.constant 0 : index
    %c256_116 = arith.constant 256 : index
    %232 = vector.load %arg3[%c0_115, %c256_116] : memref<128x512xbf16, #tpu.memory_space<vmem>>, vector<128x128xbf16>
    %cst_117 = arith.constant dense<0.000000e+00> : vector<8x128xf32>
    %233 = tpu.matmul %208, %232, %cst_117 {dimension_numbers = #tpu.dot_dimension_numbers<[1], [0], [0], [1], [0, 0, 1, 1], [], []>} : vector<8x128xbf16>, vector<128x128xbf16>, vector<8x128xf32> -> vector<8x128xf32>
    %234 = arith.addf %231, %233 : vector<8x128xf32>
    %235 = math.tanh %234 : vector<8x128xf32>
    %236 = vector.extract_strided_slice %207 {offsets = [0, 384], sizes = [8, 128], strides = [1, 1]} : vector<8x512xf32> to vector<8x128xf32>
    %c0_118 = arith.constant 0 : index
    %c384_119 = arith.constant 384 : index
    %237 = vector.load %arg3[%c0_118, %c384_119] : memref<128x512xbf16, #tpu.memory_space<vmem>>, vector<128x128xbf16>
    %cst_120 = arith.constant dense<0.000000e+00> : vector<8x128xf32>
    %238 = tpu.matmul %208, %237, %cst_120 {dimension_numbers = #tpu.dot_dimension_numbers<[1], [0], [0], [1], [0, 0, 1, 1], [], []>} : vector<8x128xbf16>, vector<128x128xbf16>, vector<8x128xf32> -> vector<8x128xf32>
    %239 = arith.addf %236, %238 : vector<8x128xf32>
    %cst_121 = arith.constant 5.000000e-01 : f32
    %240 = vector.broadcast %cst_121 : f32 to vector<8x128xf32>
    %241 = arith.mulf %240, %239 : vector<8x128xf32>
    %242 = math.tanh %241 : vector<8x128xf32>
    %cst_122 = arith.constant 5.000000e-01 : f32
    %243 = vector.broadcast %cst_122 : f32 to vector<8x128xf32>
    %244 = arith.mulf %243, %242 : vector<8x128xf32>
    %cst_123 = arith.constant 5.000000e-01 : f32
    %245 = vector.broadcast %cst_123 : f32 to vector<8x128xf32>
    %246 = arith.addf %244, %245 : vector<8x128xf32>
    %247 = arith.mulf %230, %201 : vector<8x128xf32>
    %248 = arith.mulf %219, %235 : vector<8x128xf32>
    %249 = arith.addf %247, %248 : vector<8x128xf32>
    %250 = math.tanh %249 : vector<8x128xf32>
    %251 = arith.mulf %246, %250 : vector<8x128xf32>
    %c5_i32 = arith.constant 5 : i32
    %c8_i32_124 = arith.constant 8 : i32
    %252 = arith.muli %c5_i32, %c8_i32_124 : i32
    %253 = tpu.assume_multiple %252, 8 : i32
    %254 = arith.index_cast %253 : i32 to index
    %c0_125 = arith.constant 0 : index
    %255 = vector.load %arg8[%254, %c0_125] : memref<64x512xf32, #tpu.memory_space<vmem>>, vector<8x512xf32>
    %256 = arith.truncf %251 : vector<8x128xf32> to vector<8x128xbf16>
    %257 = vector.extract_strided_slice %255 {offsets = [0, 0], sizes = [8, 128], strides = [1, 1]} : vector<8x512xf32> to vector<8x128xf32>
    %c0_126 = arith.constant 0 : index
    %c0_127 = arith.constant 0 : index
    %258 = vector.load %arg3[%c0_126, %c0_127] : memref<128x512xbf16, #tpu.memory_space<vmem>>, vector<128x128xbf16>
    %cst_128 = arith.constant dense<0.000000e+00> : vector<8x128xf32>
    %259 = tpu.matmul %256, %258, %cst_128 {dimension_numbers = #tpu.dot_dimension_numbers<[1], [0], [0], [1], [0, 0, 1, 1], [], []>} : vector<8x128xbf16>, vector<128x128xbf16>, vector<8x128xf32> -> vector<8x128xf32>
    %260 = arith.addf %257, %259 : vector<8x128xf32>
    %cst_129 = arith.constant 5.000000e-01 : f32
    %261 = vector.broadcast %cst_129 : f32 to vector<8x128xf32>
    %262 = arith.mulf %261, %260 : vector<8x128xf32>
    %263 = math.tanh %262 : vector<8x128xf32>
    %cst_130 = arith.constant 5.000000e-01 : f32
    %264 = vector.broadcast %cst_130 : f32 to vector<8x128xf32>
    %265 = arith.mulf %264, %263 : vector<8x128xf32>
    %cst_131 = arith.constant 5.000000e-01 : f32
    %266 = vector.broadcast %cst_131 : f32 to vector<8x128xf32>
    %267 = arith.addf %265, %266 : vector<8x128xf32>
    %268 = vector.extract_strided_slice %255 {offsets = [0, 128], sizes = [8, 128], strides = [1, 1]} : vector<8x512xf32> to vector<8x128xf32>
    %c0_132 = arith.constant 0 : index
    %c128_133 = arith.constant 128 : index
    %269 = vector.load %arg3[%c0_132, %c128_133] : memref<128x512xbf16, #tpu.memory_space<vmem>>, vector<128x128xbf16>
    %cst_134 = arith.constant dense<0.000000e+00> : vector<8x128xf32>
    %270 = tpu.matmul %256, %269, %cst_134 {dimension_numbers = #tpu.dot_dimension_numbers<[1], [0], [0], [1], [0, 0, 1, 1], [], []>} : vector<8x128xbf16>, vector<128x128xbf16>, vector<8x128xf32> -> vector<8x128xf32>
    %271 = arith.addf %268, %270 : vector<8x128xf32>
    %cst_135 = arith.constant 5.000000e-01 : f32
    %272 = vector.broadcast %cst_135 : f32 to vector<8x128xf32>
    %273 = arith.mulf %272, %271 : vector<8x128xf32>
    %274 = math.tanh %273 : vector<8x128xf32>
    %cst_136 = arith.constant 5.000000e-01 : f32
    %275 = vector.broadcast %cst_136 : f32 to vector<8x128xf32>
    %276 = arith.mulf %275, %274 : vector<8x128xf32>
    %cst_137 = arith.constant 5.000000e-01 : f32
    %277 = vector.broadcast %cst_137 : f32 to vector<8x128xf32>
    %278 = arith.addf %276, %277 : vector<8x128xf32>
    %279 = vector.extract_strided_slice %255 {offsets = [0, 256], sizes = [8, 128], strides = [1, 1]} : vector<8x512xf32> to vector<8x128xf32>
    %c0_138 = arith.constant 0 : index
    %c256_139 = arith.constant 256 : index
    %280 = vector.load %arg3[%c0_138, %c256_139] : memref<128x512xbf16, #tpu.memory_space<vmem>>, vector<128x128xbf16>
    %cst_140 = arith.constant dense<0.000000e+00> : vector<8x128xf32>
    %281 = tpu.matmul %256, %280, %cst_140 {dimension_numbers = #tpu.dot_dimension_numbers<[1], [0], [0], [1], [0, 0, 1, 1], [], []>} : vector<8x128xbf16>, vector<128x128xbf16>, vector<8x128xf32> -> vector<8x128xf32>
    %282 = arith.addf %279, %281 : vector<8x128xf32>
    %283 = math.tanh %282 : vector<8x128xf32>
    %284 = vector.extract_strided_slice %255 {offsets = [0, 384], sizes = [8, 128], strides = [1, 1]} : vector<8x512xf32> to vector<8x128xf32>
    %c0_141 = arith.constant 0 : index
    %c384_142 = arith.constant 384 : index
    %285 = vector.load %arg3[%c0_141, %c384_142] : memref<128x512xbf16, #tpu.memory_space<vmem>>, vector<128x128xbf16>
    %cst_143 = arith.constant dense<0.000000e+00> : vector<8x128xf32>
    %286 = tpu.matmul %256, %285, %cst_143 {dimension_numbers = #tpu.dot_dimension_numbers<[1], [0], [0], [1], [0, 0, 1, 1], [], []>} : vector<8x128xbf16>, vector<128x128xbf16>, vector<8x128xf32> -> vector<8x128xf32>
    %287 = arith.addf %284, %286 : vector<8x128xf32>
    %cst_144 = arith.constant 5.000000e-01 : f32
    %288 = vector.broadcast %cst_144 : f32 to vector<8x128xf32>
    %289 = arith.mulf %288, %287 : vector<8x128xf32>
    %290 = math.tanh %289 : vector<8x128xf32>
    %cst_145 = arith.constant 5.000000e-01 : f32
    %291 = vector.broadcast %cst_145 : f32 to vector<8x128xf32>
    %292 = arith.mulf %291, %290 : vector<8x128xf32>
    %cst_146 = arith.constant 5.000000e-01 : f32
    %293 = vector.broadcast %cst_146 : f32 to vector<8x128xf32>
    %294 = arith.addf %292, %293 : vector<8x128xf32>
    %295 = arith.mulf %278, %249 : vector<8x128xf32>
    %296 = arith.mulf %267, %283 : vector<8x128xf32>
    %297 = arith.addf %295, %296 : vector<8x128xf32>
    %298 = math.tanh %297 : vector<8x128xf32>
    %299 = arith.mulf %294, %298 : vector<8x128xf32>
    %c6_i32 = arith.constant 6 : i32
    %c8_i32_147 = arith.constant 8 : i32
    %300 = arith.muli %c6_i32, %c8_i32_147 : i32
    %301 = tpu.assume_multiple %300, 8 : i32
    %302 = arith.index_cast %301 : i32 to index
    %c0_148 = arith.constant 0 : index
    %303 = vector.load %arg8[%302, %c0_148] : memref<64x512xf32, #tpu.memory_space<vmem>>, vector<8x512xf32>
    %304 = arith.truncf %299 : vector<8x128xf32> to vector<8x128xbf16>
    %305 = vector.extract_strided_slice %303 {offsets = [0, 0], sizes = [8, 128], strides = [1, 1]} : vector<8x512xf32> to vector<8x128xf32>
    %c0_149 = arith.constant 0 : index
    %c0_150 = arith.constant 0 : index
    %306 = vector.load %arg3[%c0_149, %c0_150] : memref<128x512xbf16, #tpu.memory_space<vmem>>, vector<128x128xbf16>
    %cst_151 = arith.constant dense<0.000000e+00> : vector<8x128xf32>
    %307 = tpu.matmul %304, %306, %cst_151 {dimension_numbers = #tpu.dot_dimension_numbers<[1], [0], [0], [1], [0, 0, 1, 1], [], []>} : vector<8x128xbf16>, vector<128x128xbf16>, vector<8x128xf32> -> vector<8x128xf32>
    %308 = arith.addf %305, %307 : vector<8x128xf32>
    %cst_152 = arith.constant 5.000000e-01 : f32
    %309 = vector.broadcast %cst_152 : f32 to vector<8x128xf32>
    %310 = arith.mulf %309, %308 : vector<8x128xf32>
    %311 = math.tanh %310 : vector<8x128xf32>
    %cst_153 = arith.constant 5.000000e-01 : f32
    %312 = vector.broadcast %cst_153 : f32 to vector<8x128xf32>
    %313 = arith.mulf %312, %311 : vector<8x128xf32>
    %cst_154 = arith.constant 5.000000e-01 : f32
    %314 = vector.broadcast %cst_154 : f32 to vector<8x128xf32>
    %315 = arith.addf %313, %314 : vector<8x128xf32>
    %316 = vector.extract_strided_slice %303 {offsets = [0, 128], sizes = [8, 128], strides = [1, 1]} : vector<8x512xf32> to vector<8x128xf32>
    %c0_155 = arith.constant 0 : index
    %c128_156 = arith.constant 128 : index
    %317 = vector.load %arg3[%c0_155, %c128_156] : memref<128x512xbf16, #tpu.memory_space<vmem>>, vector<128x128xbf16>
    %cst_157 = arith.constant dense<0.000000e+00> : vector<8x128xf32>
    %318 = tpu.matmul %304, %317, %cst_157 {dimension_numbers = #tpu.dot_dimension_numbers<[1], [0], [0], [1], [0, 0, 1, 1], [], []>} : vector<8x128xbf16>, vector<128x128xbf16>, vector<8x128xf32> -> vector<8x128xf32>
    %319 = arith.addf %316, %318 : vector<8x128xf32>
    %cst_158 = arith.constant 5.000000e-01 : f32
    %320 = vector.broadcast %cst_158 : f32 to vector<8x128xf32>
    %321 = arith.mulf %320, %319 : vector<8x128xf32>
    %322 = math.tanh %321 : vector<8x128xf32>
    %cst_159 = arith.constant 5.000000e-01 : f32
    %323 = vector.broadcast %cst_159 : f32 to vector<8x128xf32>
    %324 = arith.mulf %323, %322 : vector<8x128xf32>
    %cst_160 = arith.constant 5.000000e-01 : f32
    %325 = vector.broadcast %cst_160 : f32 to vector<8x128xf32>
    %326 = arith.addf %324, %325 : vector<8x128xf32>
    %327 = vector.extract_strided_slice %303 {offsets = [0, 256], sizes = [8, 128], strides = [1, 1]} : vector<8x512xf32> to vector<8x128xf32>
    %c0_161 = arith.constant 0 : index
    %c256_162 = arith.constant 256 : index
    %328 = vector.load %arg3[%c0_161, %c256_162] : memref<128x512xbf16, #tpu.memory_space<vmem>>, vector<128x128xbf16>
    %cst_163 = arith.constant dense<0.000000e+00> : vector<8x128xf32>
    %329 = tpu.matmul %304, %328, %cst_163 {dimension_numbers = #tpu.dot_dimension_numbers<[1], [0], [0], [1], [0, 0, 1, 1], [], []>} : vector<8x128xbf16>, vector<128x128xbf16>, vector<8x128xf32> -> vector<8x128xf32>
    %330 = arith.addf %327, %329 : vector<8x128xf32>
    %331 = math.tanh %330 : vector<8x128xf32>
    %332 = vector.extract_strided_slice %303 {offsets = [0, 384], sizes = [8, 128], strides = [1, 1]} : vector<8x512xf32> to vector<8x128xf32>
    %c0_164 = arith.constant 0 : index
    %c384_165 = arith.constant 384 : index
    %333 = vector.load %arg3[%c0_164, %c384_165] : memref<128x512xbf16, #tpu.memory_space<vmem>>, vector<128x128xbf16>
    %cst_166 = arith.constant dense<0.000000e+00> : vector<8x128xf32>
    %334 = tpu.matmul %304, %333, %cst_166 {dimension_numbers = #tpu.dot_dimension_numbers<[1], [0], [0], [1], [0, 0, 1, 1], [], []>} : vector<8x128xbf16>, vector<128x128xbf16>, vector<8x128xf32> -> vector<8x128xf32>
    %335 = arith.addf %332, %334 : vector<8x128xf32>
    %cst_167 = arith.constant 5.000000e-01 : f32
    %336 = vector.broadcast %cst_167 : f32 to vector<8x128xf32>
    %337 = arith.mulf %336, %335 : vector<8x128xf32>
    %338 = math.tanh %337 : vector<8x128xf32>
    %cst_168 = arith.constant 5.000000e-01 : f32
    %339 = vector.broadcast %cst_168 : f32 to vector<8x128xf32>
    %340 = arith.mulf %339, %338 : vector<8x128xf32>
    %cst_169 = arith.constant 5.000000e-01 : f32
    %341 = vector.broadcast %cst_169 : f32 to vector<8x128xf32>
    %342 = arith.addf %340, %341 : vector<8x128xf32>
    %343 = arith.mulf %326, %297 : vector<8x128xf32>
    %344 = arith.mulf %315, %331 : vector<8x128xf32>
    %345 = arith.addf %343, %344 : vector<8x128xf32>
    %346 = math.tanh %345 : vector<8x128xf32>
    %347 = arith.mulf %342, %346 : vector<8x128xf32>
    %c7_i32 = arith.constant 7 : i32
    %c8_i32_170 = arith.constant 8 : i32
    %348 = arith.muli %c7_i32, %c8_i32_170 : i32
    %349 = tpu.assume_multiple %348, 8 : i32
    %350 = arith.index_cast %349 : i32 to index
    %c0_171 = arith.constant 0 : index
    %351 = vector.load %arg8[%350, %c0_171] : memref<64x512xf32, #tpu.memory_space<vmem>>, vector<8x512xf32>
    %352 = arith.truncf %347 : vector<8x128xf32> to vector<8x128xbf16>
    %353 = vector.extract_strided_slice %351 {offsets = [0, 0], sizes = [8, 128], strides = [1, 1]} : vector<8x512xf32> to vector<8x128xf32>
    %c0_172 = arith.constant 0 : index
    %c0_173 = arith.constant 0 : index
    %354 = vector.load %arg3[%c0_172, %c0_173] : memref<128x512xbf16, #tpu.memory_space<vmem>>, vector<128x128xbf16>
    %cst_174 = arith.constant dense<0.000000e+00> : vector<8x128xf32>
    %355 = tpu.matmul %352, %354, %cst_174 {dimension_numbers = #tpu.dot_dimension_numbers<[1], [0], [0], [1], [0, 0, 1, 1], [], []>} : vector<8x128xbf16>, vector<128x128xbf16>, vector<8x128xf32> -> vector<8x128xf32>
    %356 = arith.addf %353, %355 : vector<8x128xf32>
    %cst_175 = arith.constant 5.000000e-01 : f32
    %357 = vector.broadcast %cst_175 : f32 to vector<8x128xf32>
    %358 = arith.mulf %357, %356 : vector<8x128xf32>
    %359 = math.tanh %358 : vector<8x128xf32>
    %cst_176 = arith.constant 5.000000e-01 : f32
    %360 = vector.broadcast %cst_176 : f32 to vector<8x128xf32>
    %361 = arith.mulf %360, %359 : vector<8x128xf32>
    %cst_177 = arith.constant 5.000000e-01 : f32
    %362 = vector.broadcast %cst_177 : f32 to vector<8x128xf32>
    %363 = arith.addf %361, %362 : vector<8x128xf32>
    %364 = vector.extract_strided_slice %351 {offsets = [0, 128], sizes = [8, 128], strides = [1, 1]} : vector<8x512xf32> to vector<8x128xf32>
    %c0_178 = arith.constant 0 : index
    %c128_179 = arith.constant 128 : index
    %365 = vector.load %arg3[%c0_178, %c128_179] : memref<128x512xbf16, #tpu.memory_space<vmem>>, vector<128x128xbf16>
    %cst_180 = arith.constant dense<0.000000e+00> : vector<8x128xf32>
    %366 = tpu.matmul %352, %365, %cst_180 {dimension_numbers = #tpu.dot_dimension_numbers<[1], [0], [0], [1], [0, 0, 1, 1], [], []>} : vector<8x128xbf16>, vector<128x128xbf16>, vector<8x128xf32> -> vector<8x128xf32>
    %367 = arith.addf %364, %366 : vector<8x128xf32>
    %cst_181 = arith.constant 5.000000e-01 : f32
    %368 = vector.broadcast %cst_181 : f32 to vector<8x128xf32>
    %369 = arith.mulf %368, %367 : vector<8x128xf32>
    %370 = math.tanh %369 : vector<8x128xf32>
    %cst_182 = arith.constant 5.000000e-01 : f32
    %371 = vector.broadcast %cst_182 : f32 to vector<8x128xf32>
    %372 = arith.mulf %371, %370 : vector<8x128xf32>
    %cst_183 = arith.constant 5.000000e-01 : f32
    %373 = vector.broadcast %cst_183 : f32 to vector<8x128xf32>
    %374 = arith.addf %372, %373 : vector<8x128xf32>
    %375 = vector.extract_strided_slice %351 {offsets = [0, 256], sizes = [8, 128], strides = [1, 1]} : vector<8x512xf32> to vector<8x128xf32>
    %c0_184 = arith.constant 0 : index
    %c256_185 = arith.constant 256 : index
    %376 = vector.load %arg3[%c0_184, %c256_185] : memref<128x512xbf16, #tpu.memory_space<vmem>>, vector<128x128xbf16>
    %cst_186 = arith.constant dense<0.000000e+00> : vector<8x128xf32>
    %377 = tpu.matmul %352, %376, %cst_186 {dimension_numbers = #tpu.dot_dimension_numbers<[1], [0], [0], [1], [0, 0, 1, 1], [], []>} : vector<8x128xbf16>, vector<128x128xbf16>, vector<8x128xf32> -> vector<8x128xf32>
    %378 = arith.addf %375, %377 : vector<8x128xf32>
    %379 = math.tanh %378 : vector<8x128xf32>
    %380 = vector.extract_strided_slice %351 {offsets = [0, 384], sizes = [8, 128], strides = [1, 1]} : vector<8x512xf32> to vector<8x128xf32>
    %c0_187 = arith.constant 0 : index
    %c384_188 = arith.constant 384 : index
    %381 = vector.load %arg3[%c0_187, %c384_188] : memref<128x512xbf16, #tpu.memory_space<vmem>>, vector<128x128xbf16>
    %cst_189 = arith.constant dense<0.000000e+00> : vector<8x128xf32>
    %382 = tpu.matmul %352, %381, %cst_189 {dimension_numbers = #tpu.dot_dimension_numbers<[1], [0], [0], [1], [0, 0, 1, 1], [], []>} : vector<8x128xbf16>, vector<128x128xbf16>, vector<8x128xf32> -> vector<8x128xf32>
    %383 = arith.addf %380, %382 : vector<8x128xf32>
    %cst_190 = arith.constant 5.000000e-01 : f32
    %384 = vector.broadcast %cst_190 : f32 to vector<8x128xf32>
    %385 = arith.mulf %384, %383 : vector<8x128xf32>
    %386 = math.tanh %385 : vector<8x128xf32>
    %cst_191 = arith.constant 5.000000e-01 : f32
    %387 = vector.broadcast %cst_191 : f32 to vector<8x128xf32>
    %388 = arith.mulf %387, %386 : vector<8x128xf32>
    %cst_192 = arith.constant 5.000000e-01 : f32
    %389 = vector.broadcast %cst_192 : f32 to vector<8x128xf32>
    %390 = arith.addf %388, %389 : vector<8x128xf32>
    %391 = arith.mulf %374, %345 : vector<8x128xf32>
    %392 = arith.mulf %363, %379 : vector<8x128xf32>
    %393 = arith.addf %391, %392 : vector<8x128xf32>
    %394 = math.tanh %393 : vector<8x128xf32>
    %395 = arith.mulf %390, %394 : vector<8x128xf32>
    %c8_i32_193 = arith.constant 8 : i32
    %c0_194 = arith.constant 0 : index
    %c0_195 = arith.constant 0 : index
    %396 = vector.load %arg9[%c0_194, %c0_195] : memref<8x128xf32, #tpu.memory_space<vmem>>, vector<8x128xf32>
    tpu.vector_store %arg9[%c0_194, %c0_195], %395 {strides = array<i32>} : memref<8x128xf32, #tpu.memory_space<vmem>>, vector<8x128xf32>,
    %c0_196 = arith.constant 0 : index
    %c0_197 = arith.constant 0 : index
    %397 = vector.load %arg10[%c0_196, %c0_197] : memref<8x128xf32, #tpu.memory_space<vmem>>, vector<8x128xf32>
    tpu.vector_store %arg10[%c0_196, %c0_197], %393 {strides = array<i32>} : memref<8x128xf32, #tpu.memory_space<vmem>>, vector<8x128xf32>,
    %c0_i32_198 = arith.constant 0 : i32
    %398 = arith.cmpi eq, %arg0, %c0_i32_198 : i32
    %399 = arith.extui %398 : i1 to i32
    %c0_i32_199 = arith.constant 0 : i32
    %400 = arith.cmpi ne, %399, %c0_i32_199 : i32
    scf.if %400 {
      %c0_200 = arith.constant 0 : index
      %c0_201 = arith.constant 0 : index
      %401 = vector.load %arg5[%c0_200, %c0_201] : memref<128x128xf32, #tpu.memory_space<vmem>>, vector<128x128xf32>
      %cst_202 = arith.constant dense<0.000000e+00> : vector<8x128xf32>
      %402 = tpu.matmul %395, %401, %cst_202 {dimension_numbers = #tpu.dot_dimension_numbers<[1], [0], [0], [1], [0, 0, 1, 1], [], []>} : vector<8x128xf32>, vector<128x128xf32>, vector<8x128xf32> -> vector<8x128xf32>
      %c0_203 = arith.constant 0 : index
      %c0_204 = arith.constant 0 : index
      %403 = vector.load %arg6[%c0_203, %c0_204] : memref<1x128xf32, #tpu.memory_space<vmem>>, vector<1x128xf32>
      %404 = vector.broadcast %403 : vector<1x128xf32> to vector<8x128xf32>
      %405 = arith.addf %402, %404 : vector<8x128xf32>
      %c0_205 = arith.constant 0 : index
      %c0_206 = arith.constant 0 : index
      %406 = vector.load %arg7[%c0_205, %c0_206] : memref<8x128xf32, #tpu.memory_space<vmem>>, vector<8x128xf32>
      tpu.vector_store %arg7[%c0_205, %c0_206], %405 {strides = array<i32>} : memref<8x128xf32, #tpu.memory_space<vmem>>, vector<8x128xf32>,
    } else {
    }
    return
  }
  func.func @transform_0(%arg0: i32) -> (i32, i32) {
    %c0_i32 = arith.constant 0 : i32
    %c0_i32_0 = arith.constant 0 : i32
    return %arg0, %c0_i32 : i32, i32
  }
  func.func @transform_1(%arg0: i32) -> (i32, i32) {
    %c0_i32 = arith.constant 0 : i32
    %c0_i32_0 = arith.constant 0 : i32
    %c0_i32_1 = arith.constant 0 : i32
    return %c0_i32, %c0_i32_0 : i32, i32
  }
  func.func @transform_2(%arg0: i32) -> (i32, i32) {
    %c0_i32 = arith.constant 0 : i32
    %c0_i32_0 = arith.constant 0 : i32
    %c0_i32_1 = arith.constant 0 : i32
    return %c0_i32, %c0_i32_0 : i32, i32
  }
  func.func @transform_3(%arg0: i32) -> (i32, i32) {
    %c0_i32 = arith.constant 0 : i32
    %c0_i32_0 = arith.constant 0 : i32
    %c0_i32_1 = arith.constant 0 : i32
    return %c0_i32, %c0_i32_0 : i32, i32
  }
  func.func @transform_4(%arg0: i32) -> (i32, i32) {
    %c0_i32 = arith.constant 0 : i32
    %c0_i32_0 = arith.constant 0 : i32
    %c0_i32_1 = arith.constant 0 : i32
    return %c0_i32, %c0_i32_0 : i32, i32
  }
  func.func @transform_5(%arg0: i32) -> (i32, i32) {
    %c0_i32 = arith.constant 0 : i32
    %c0_i32_0 = arith.constant 0 : i32
    %c0_i32_1 = arith.constant 0 : i32
    return %c0_i32, %c0_i32_0 : i32, i32
  }
  func.func @transform_6(%arg0: i32) -> (i32, i32) {
    %c0_i32 = arith.constant 0 : i32
    %c0_i32_0 = arith.constant 0 : i32
    %c0_i32_1 = arith.constant 0 : i32
    return %c0_i32, %c0_i32_0 : i32, i32
  }
}

</mosaic_0001>

<bundles_post_ra>
// kernel: tpu_custom_call.1
= control target key start
LH: loop header
LB: loop body
LE: loop exit
PB: predicated region body
PF: predicated region fallthrough
CT: control target
= control target key end

     0   :  { %11 = vsyncpa [#allocation6], 0  ;;  %s4535_s0 = inlined_call_operand.vmem [shape: bf16[64,21], index: 0, kind: input, shape index: {}]   ;;  %s4536_s1 = inlined_call_operand.hbm [shape: bf16[21,512], index: 1, kind: input, shape index: {}]   ;;  %s4537_s2 = inlined_call_operand.hbm [shape: bf16[128,512], index: 2, kind: input, shape index: {}]   ;;  %s4538_s3 = inlined_call_operand.vmem [shape: f32[1,512], index: 3, kind: input, shape index: {}]   ;;  %s4539_s4 = inlined_call_operand.hbm [shape: f32[128,128], index: 4, kind: input, shape index: {}]   ;;  %s4540_s5 = inlined_call_operand.vmem [shape: f32[1,128], index: 5, kind: input, shape index: {}]   ;;  %s4541_s6 = inlined_call_operand.hbm [shape: f32[8,128], index: 6, kind: output, shape index: {}]  }
   0x1   :  { %12 = vsyncpa [#allocation9], 0 }
   0x2   :  { %13 = vsyncpa [#allocation7], 0  ;;  %s3555_s21 = smov [#allocation8]   ;;  %s3556_s23 = smov [#allocation5]  }
   0x3   :  { %s33_s22 = sshll.u32 %s3555_s21, 4  ;;  %s21_s24 = sshll.u32 %s3556_s23, 4  ;;  %s34_s22 = int_to_ptr.vmem [resolvable:$true] %s33_s22  ;;  %s22_s24 = int_to_ptr.vmem [resolvable:$true] %s21_s24 }
   0x4   :  { %s3477_s25 = scalar_lea.vmem %s34_s22, 4096  ;;  %p3482_p1 = scmp.lt.s32.totalorder %s34_s22, %s34_s22 }
   0x5   :  { %p3478_p0 = scmp.ne.s32.totalorder %s34_s22, %s3477_s25  ;;  %p3483_p2 = scmp.lt.s32.totalorder %s3477_s25, %s3477_s25 }
   0x7   :  { %p3484_p3 = por %p3483_p2, %p3482_p1 }
   0x9   :  { %p3485_p4 = pnand %p3484_p3, %p3478_p0 }
   0xb   :  { %3488 = shalt.err (!%p3485_p4)
}
   0xc   :  { %s3557_s26 = smov 256   ;;  %s3558_s27 = smov 16  }
   0xd   :  { %39 = dma.hbm_to_vmem [thread:$0]  %s4537_s2, 4096, %s34_s22, [#allocation9], %s3557_s26, %s3557_s26, %s3558_s27  }
   0xe   :  { %s3497_s30 = scalar_lea.vmem %s22_s24, 768  ;;  %p3502_p6 = scmp.lt.s32.totalorder %s22_s24, %s22_s24 }
   0xf   :  { %p3498_p5 = scmp.ne.s32.totalorder %s22_s24, %s3497_s30  ;;  %p3503_p7 = scmp.lt.s32.totalorder %s3497_s30, %s3497_s30 }
  0x11   :  { %p3504_p8 = por %p3503_p7, %p3502_p6 }
  0x13   :  { %p3505_p9 = pnand %p3504_p8, %p3498_p5 }
  0x15   :  { %3508 = shalt.err (!%p3505_p9)
}
  0x16   :  { %27 = dma.hbm_to_vmem [thread:$0]  %s4536_s1, 768, %s22_s24, [#allocation6], %s3557_s26, %s3557_s26, %s3558_s27  }
  0x17   :  { %s3559_s9 = smov [#allocation10]  }
  0x18   :  { %s47_s10 = sshll.u32 %s3559_s9, 4  ;;  %s48_s10 = int_to_ptr.vmem [resolvable:$true] %s47_s10 }
  0x19   :  { %s3517_s11 = scalar_lea.vmem %s48_s10, 2048  ;;  %p3522_p11 = scmp.lt.s32.totalorder %s48_s10, %s48_s10 }
  0x1a   :  { %p3518_p10 = scmp.ne.s32.totalorder %s48_s10, %s3517_s11  ;;  %p3523_p12 = scmp.lt.s32.totalorder %s3517_s11, %s3517_s11 }
  0x1c   :  { %p3524_p13 = por %p3523_p12, %p3522_p11 }
  0x1e   :  { %p3525_p0 = pnand %p3524_p13, %p3518_p10 }
  0x20   :  { %3528 = shalt.err (!%p3525_p0)
}
  0x21   :  { %s3560_s2 = smov 128   ;;  %s3561_s12 = smov 8  }
  0x22   :  { %53 = dma.hbm_to_vmem [thread:$0]  %s4539_s4, 2048, %s48_s10, [#allocation9], %s3560_s2, %s3560_s2, %s3561_s12  }
  0x23   :  { %3549 = dma.done.wait [#allocation6], 768  }
  0x24   :  { %3550 = vsyncadd [#allocation6], 4294966528 }
  0x25   :  { %3551 = dma.done.wait [#allocation9], 6144  }
  0x26   :  { %3552 = vsyncadd [#allocation9], 4294961152  ;;  %vm171_vm0 = vcmask 1041408   ;;  %v3562_v0 = vmov 0   ;;  %vm172_vm1 = vcmask 1042432   ;;  %v3563_v1 = vmov 65535  }
  0x27   :  { %219 = vmatprep.mubr.bf16.mxu0 %v3562_v0  ;;  %292 = vmatprep.mubr.bf16.mxu1 %v3562_v0  ;;  %v173_v2 = vsel %vm171_vm0, 4294967295, %v3563_v1  ;;  %v84_v3 = vld [vmem:[#allocation5 + $0x20] sm:$0x77]  ;;  %v85_v5 = vld [vmem:[#allocation5 + $0x28] sm:$0x77]  ;;  %vm158_vm2 = vcmask 171008   ;;  %v88_v56 = vlaneseq }
  0x28   :  { %v174_v4 = vsel %vm172_vm1, %v173_v2, 0  ;;  %v2274_v6 = vcombine.high %v84_v3, %v84_v3  ;;  %v2276_v7 = vcombine.high %v85_v5, %v85_v5  ;;  %v2273_v8 = vcombine.low %v84_v3, %v84_v3  ;;  %v3315_v10 = vld [vmem:[#allocation5 + $0x4] ss:$16 sps:$4 sm:$0xff]   ;;  %v3317_v15 = vld [vmem:[#allocation5 + $0xc] ss:$16 sps:$4 sm:$0xff]   ;;  %s3567_s23 = smov [#allocation11]  }
  0x29   :  { %v2275_v9 = vcombine.low %v85_v5, %v85_v5  ;;  %v3319_v16 = vld [vmem:[#allocation5] ss:$16 sps:$4 sm:$0xff]   ;;  %v3320_v17 = vld [vmem:[#allocation5 + $0x8] ss:$16 sps:$4 sm:$0xff]   ;;  %v3619_v20 = vld [vmem:[#allocation8 + $0xe4] ss:$16 sps:$4 sm:$0xff]  }
  0x2a   :  { %v179_v11 = vand.u32 %v2274_v6, %v174_v4  ;;  %v185_v12 = vand.u32 %v2276_v7, %v174_v4  ;;  %v176_v13 = vand.u32 %v2273_v8, %v174_v4  ;;  %v3321_v18 = vld [vmem:[%s4535_s0] sm:$0xff]   ;;  %v4542_v21 = vmov 0.0   ;;  %v3326_v24 = vld [vmem:[%s4535_s0 + $0x8] sm:$0xff]   ;;  %v3331_v29 = vld [vmem:[%s4535_s0 + $0x10] sm:$0xff]   ;;  %s2248_s24 = sshll.u32 %s3567_s23, 4  ;;  %s2249_s24 = int_to_ptr.vmem [resolvable:$true] %s2248_s24 }
  0x2b   :  { %v182_v14 = vand.u32 %v2275_v9, %v174_v4  ;;  %v3617_v19 = vld [vmem:[#allocation8 + $0xe0] ss:$16 sps:$4 sm:$0xff]   ;;  %v3629_v23 = vld [vmem:[#allocation8 + $0xc4] ss:$16 sps:$4 sm:$0xff]   ;;  %v3336_v34 = vld [vmem:[%s4535_s0 + $0x18] sm:$0xff]   ;;  %vm3565_vm3 = vmmov 0   ;;  %p3534_p2 = scmp.lt.s32.totalorder %s2249_s24, %s2249_s24 }
  0x2c   :  { %199 = vmatprep.subr.bf16.mxu0 %v179_v11  ;;  %272 = vmatprep.subr.bf16.mxu1 %v185_v12  ;;  %v3625_v22 = vld [vmem:[#allocation8 + $0xc0] ss:$16 sps:$4 sm:$0xff]   ;;  %v3642_v26 = vld [vmem:[#allocation8 + $0xa4] ss:$16 sps:$4 sm:$0xff]   ;;  %v3708_v39 = vld [vmem:[#allocation8 + $0xe8] ss:$16 sps:$4 sm:$0xff]  }
  0x2d   :  { %200 = vmatpush1.bf16.msra.mxu0 %v176_v13  ;;  %273 = vmatpush1.bf16.msra.mxu1 %v182_v14  ;;  %v3638_v25 = vld [vmem:[#allocation8 + $0xa0] ss:$16 sps:$4 sm:$0xff]   ;;  %v3652_v28 = vld [vmem:[#allocation8 + $0x84] ss:$16 sps:$4 sm:$0xff]   ;;  %v3710_v40 = vld [vmem:[#allocation8 + $0xec] ss:$16 sps:$4 sm:$0xff]  }
  0x2e   :  { %201 = vmatprep.subr.bf16.mxu0 %v3315_v10  ;;  %274 = vmatprep.subr.bf16.mxu1 %v3317_v15  ;;  %v3648_v27 = vld [vmem:[#allocation8 + $0x80] ss:$16 sps:$4 sm:$0xff]   ;;  %v3665_v31 = vld [vmem:[#allocation8 + $0x64] ss:$16 sps:$4 sm:$0xff]   ;;  %v3566_v41 = vmov 0.0|0.0   ;;  %v89_v57 = vshrl.u32 %v88_v56, 7 }
  0x2f   :  { %v3661_v30 = vld [vmem:[#allocation8 + $0x60] ss:$16 sps:$4 sm:$0xff]   ;;  %v3675_v33 = vld [vmem:[#allocation8 + $0x44] ss:$16 sps:$4 sm:$0xff]   ;;  %v3716_v42 = vld [vmem:[#allocation8 + $0xc8] ss:$16 sps:$4 sm:$0xff]  }
  0x30   :  { %v3671_v32 = vld [vmem:[#allocation8 + $0x40] ss:$16 sps:$4 sm:$0xff]   ;;  %v3688_v36 = vld [vmem:[#allocation8 + $0x24] ss:$16 sps:$4 sm:$0xff]   ;;  %v3718_v43 = vld [vmem:[#allocation8 + $0xcc] ss:$16 sps:$4 sm:$0xff]  }
  0x31   :  { %202 = vmatpush1.bf16.msra.mxu0 %v3319_v16  ;;  %275 = vmatpush1.bf16.msra.mxu1 %v3320_v17  ;;  %v3684_v35 = vld [vmem:[#allocation8 + $0x20] ss:$16 sps:$4 sm:$0xff]   ;;  %v3698_v38 = vld [vmem:[#allocation8 + $0x4] ss:$16 sps:$4 sm:$0xff]   ;;  %v3728_v44 = vld [vmem:[#allocation8 + $0xa8] ss:$16 sps:$4 sm:$0xff]  }
  0x32   :  { %2623 = vmatprep.subr.bf16.mxu0 %v4542_v21  ;;  %2643 = vmatprep.subr.bf16.mxu1 %v4542_v21  ;;  %v3694_v37 = vld [vmem:[#allocation8] ss:$16 sps:$4 sm:$0xff]   ;;  %v3730_v45 = vld [vmem:[#allocation8 + $0xac] ss:$16 sps:$4 sm:$0xff]   ;;  %v3736_v46 = vld [vmem:[#allocation8 + $0x88] ss:$16 sps:$4 sm:$0xff]  }
  0x33   :  { %v3738_v47 = vld [vmem:[#allocation8 + $0x8c] ss:$16 sps:$4 sm:$0xff]   ;;  %v3744_v48 = vld [vmem:[#allocation8 + $0x68] ss:$16 sps:$4 sm:$0xff]   ;;  %v98_v58 = vsub.s32 2, %v89_v57  ;;  %v90_v59 = vsub.s32 0, %v89_v57 }
  0x34   :  { %2277 = vmatmul.mubr.msk.bf16.vlgmr.msra.gmra.mxu0 %vm158_vm2, %v3321_v18  ;;  %2281 = vmatmul.mubr.msk.bf16.vlgmr.msra.gmra.mxu1 %vm158_vm2, %v3321_v18  ;;  %v3746_v49 = vld [vmem:[#allocation8 + $0x6c] ss:$16 sps:$4 sm:$0xff]   ;;  %v3752_v50 = vld [vmem:[#allocation8 + $0x48] ss:$16 sps:$4 sm:$0xff]   ;;  %v102_v60 = vsub.s32 3, %v89_v57  ;;  %v94_v1 = vsub.s32 1, %v89_v57 }
  0x35   :  { %2624 = vmatpush3.bf16.msra.mxu0 %v3617_v19  ;;  %2644 = vmatpush3.bf16.msra.mxu1 %v3619_v20  ;;  %v3754_v51 = vld [vmem:[#allocation8 + $0x4c] ss:$16 sps:$4 sm:$0xff]   ;;  %v3760_v52 = vld [vmem:[#allocation8 + $0x28] ss:$16 sps:$4 sm:$0xff]   ;;  %v86_v61 = vld [vmem:[%s4538_s3] sm:$0xf] }
  0x36   :  { %2625 = vmatprep.subr.bf16.mxu0 %v4542_v21  ;;  %2645 = vmatprep.subr.bf16.mxu1 %v4542_v21  ;;  %v3762_v53 = vld [vmem:[#allocation8 + $0x2c] ss:$16 sps:$4 sm:$0xff]   ;;  %v3768_v54 = vld [vmem:[#allocation8 + $0x8] ss:$16 sps:$4 sm:$0xff]   ;;  %v3827_v4 = vrot.slane %v86_v61, %v90_v59  ;;  %v3829_v5 = vrot.slane %v86_v61, %v102_v60  ;;  %v3831_v8 = vrot.slane %v86_v61, %v94_v1  ;;  %s3529_s25 = scalar_lea.vmem %s2249_s24, 128 }
  0x37   :  { %229 = vmatprep.mubr.bf16.mxu0 %v3562_v0  ;;  %302 = vmatprep.mubr.bf16.mxu1 %v3562_v0  ;;  %v3770_v55 = vld [vmem:[#allocation8 + $0xc] ss:$16 sps:$4 sm:$0xff]   ;;  %p3530_p1 = scmp.ne.s32.totalorder %s2249_s24, %s3529_s25  ;;  %p3535_p3 = scmp.lt.s32.totalorder %s3529_s25, %s3529_s25 }
  0x39   :  { %2626 = vmatpush3.bf16.msra.mxu0 %v3625_v22  ;;  %2646 = vmatpush3.bf16.msra.mxu1 %v3629_v23  ;;  %p3536_p4 = por %p3535_p3, %p3534_p2 }
  0x3a   :  { %2627 = vmatprep.subr.bf16.mxu0 %v4542_v21  ;;  %2647 = vmatprep.subr.bf16.mxu1 %v4542_v21 }
  0x3b   :  { %p3537_p5 = pnand %p3536_p4, %p3530_p1 }
  0x3c   :  { %2278 = vmatmul.mubr.msk.bf16.gmra.mxu0 %vm158_vm2, %v3326_v24  ;;  %2282 = vmatmul.mubr.msk.bf16.gmra.mxu1 %vm158_vm2, %v3326_v24 }
  0x3d   :  { %2628 = vmatpush3.bf16.msra.mxu0 %v3638_v25  ;;  %2648 = vmatpush3.bf16.msra.mxu1 %v3642_v26 }
  0x3e   :  { %2629 = vmatprep.subr.bf16.mxu0 %v4542_v21  ;;  %2649 = vmatprep.subr.bf16.mxu1 %v4542_v21 }
  0x3f   :  { %239 = vmatprep.mubr.bf16.mxu0 %v3562_v0  ;;  %312 = vmatprep.mubr.bf16.mxu1 %v3562_v0 }
  0x41   :  { %2630 = vmatpush3.bf16.msra.mxu0 %v3648_v27  ;;  %2650 = vmatpush3.bf16.msra.mxu1 %v3652_v28 }
  0x42   :  { %2631 = vmatprep.subr.bf16.mxu0 %v4542_v21  ;;  %2651 = vmatprep.subr.bf16.mxu1 %v4542_v21 }
  0x44   :  { %2279 = vmatmul.mubr.msk.bf16.gmra.mxu0 %vm158_vm2, %v3331_v29  ;;  %2283 = vmatmul.mubr.msk.bf16.gmra.mxu1 %vm158_vm2, %v3331_v29 }
  0x45   :  { %2632 = vmatpush3.bf16.msra.mxu0 %v3661_v30  ;;  %2652 = vmatpush3.bf16.msra.mxu1 %v3665_v31 }
  0x46   :  { %2633 = vmatprep.subr.bf16.mxu0 %v4542_v21  ;;  %2653 = vmatprep.subr.bf16.mxu1 %v4542_v21 }
  0x47   :  { %249 = vmatprep.mubr.bf16.mxu0 %v3562_v0  ;;  %322 = vmatprep.mubr.bf16.mxu1 %v3562_v0  ;;  %v3821_v0 = vrot.slane %v86_v61, %v98_v58 }
  0x49   :  { %2634 = vmatpush3.bf16.msra.mxu0 %v3671_v32  ;;  %2654 = vmatpush3.bf16.msra.mxu1 %v3675_v33 }
  0x4a   :  { %2635 = vmatprep.subr.bf16.mxu0 %v4542_v21  ;;  %2655 = vmatprep.subr.bf16.mxu1 %v4542_v21 }
  0x4c   :  { %2280 = vmatmul.mubr.msk.bf16.gmra.mxu0 %vm158_vm2, %v3336_v34  ;;  %2284 = vmatmul.mubr.msk.bf16.gmra.mxu1 %vm158_vm2, %v3336_v34 }
  0x4d   :  { %2636 = vmatpush3.bf16.msra.mxu0 %v3684_v35  ;;  %2656 = vmatpush3.bf16.msra.mxu1 %v3688_v36 }
  0x4e   :  { %2637 = vmatprep.subr.bf16.mxu0 %v4542_v21  ;;  %2657 = vmatprep.subr.bf16.mxu1 %v4542_v21 }
  0x4f   :  { %2639 = vmatprep.mubr.msk.bf16.mxu0 %vm3565_vm3, %v4542_v21  ;;  %2659 = vmatprep.mubr.msk.bf16.mxu1 %vm3565_vm3, %v4542_v21 }
  0x51   :  { %2638 = vmatpush3.bf16.msra.mxu0 %v3694_v37  ;;  %2658 = vmatpush3.bf16.msra.mxu1 %v3698_v38 }
  0x52   :  { %2663 = vmatprep.subr.bf16.mxu0 %v4542_v21  ;;  %2683 = vmatprep.subr.bf16.mxu1 %v4542_v21 }
  0x54   :  { %2640 = vmatmul.mubr.bf16.vlgmr.msra.gmra.mxu0 %v3566_v41  ;;  %2660 = vmatmul.mubr.bf16.vlgmr.msra.gmra.mxu1 %v3566_v41 }
  0x55   :  { %2664 = vmatpush3.bf16.msra.mxu0 %v3708_v39  ;;  %2684 = vmatpush3.bf16.msra.mxu1 %v3710_v40 }
  0x56   :  { %2665 = vmatprep.subr.bf16.mxu0 %v4542_v21  ;;  %2685 = vmatprep.subr.bf16.mxu1 %v4542_v21 }
  0x57   :  { %2679 = vmatprep.mubr.msk.bf16.mxu0 %vm3565_vm3, %v4542_v21  ;;  %2699 = vmatprep.mubr.msk.bf16.mxu1 %vm3565_vm3, %v4542_v21 }
  0x59   :  { %2666 = vmatpush3.bf16.msra.mxu0 %v3716_v42  ;;  %2686 = vmatpush3.bf16.msra.mxu1 %v3718_v43 }
  0x5a   :  { %2667 = vmatprep.subr.bf16.mxu0 %v4542_v21  ;;  %2687 = vmatprep.subr.bf16.mxu1 %v4542_v21 }
  0x5d   :  { %2668 = vmatpush3.bf16.msra.mxu0 %v3728_v44  ;;  %2688 = vmatpush3.bf16.msra.mxu1 %v3730_v45 }
  0x5e   :  { %2669 = vmatprep.subr.bf16.mxu0 %v4542_v21  ;;  %2689 = vmatprep.subr.bf16.mxu1 %v4542_v21 }
  0x61   :  { %2670 = vmatpush3.bf16.msra.mxu0 %v3736_v46  ;;  %2690 = vmatpush3.bf16.msra.mxu1 %v3738_v47 }
  0x62   :  { %2671 = vmatprep.subr.bf16.mxu0 %v4542_v21  ;;  %2691 = vmatprep.subr.bf16.mxu1 %v4542_v21 }
  0x65   :  { %2672 = vmatpush3.bf16.msra.mxu0 %v3744_v48  ;;  %2692 = vmatpush3.bf16.msra.mxu1 %v3746_v49 }
  0x66   :  { %2673 = vmatprep.subr.bf16.mxu0 %v4542_v21  ;;  %2693 = vmatprep.subr.bf16.mxu1 %v4542_v21 }
  0x69   :  { %2674 = vmatpush3.bf16.msra.mxu0 %v3752_v50  ;;  %2694 = vmatpush3.bf16.msra.mxu1 %v3754_v51 }
  0x6a   :  { %2675 = vmatprep.subr.bf16.mxu0 %v4542_v21  ;;  %2695 = vmatprep.subr.bf16.mxu1 %v4542_v21 }
  0x6d   :  { %2676 = vmatpush3.bf16.msra.mxu0 %v3760_v52  ;;  %2696 = vmatpush3.bf16.msra.mxu1 %v3762_v53 }
  0x6e   :  { %2677 = vmatprep.subr.bf16.mxu0 %v4542_v21  ;;  %2697 = vmatprep.subr.bf16.mxu1 %v4542_v21 }
  0x71   :  { %2678 = vmatpush3.bf16.msra.mxu0 %v3768_v54  ;;  %2698 = vmatpush3.bf16.msra.mxu1 %v3770_v55 }
  0x72   :  { %2703 = vmatprep.subr.bf16.mxu0 %v4542_v21  ;;  %2723 = vmatprep.subr.bf16.mxu1 %v4542_v21 }
  0x74   :  { %2680 = vmatmul.mubr.bf16.vlgmr.msra.gmra.mxu0 %v3566_v41  ;;  %2700 = vmatmul.mubr.bf16.vlgmr.msra.gmra.mxu1 %v3566_v41 }
  0x75   :  { %2704 = vmatpush3.bf16.msra.mxu0 %v3617_v19  ;;  %2724 = vmatpush3.bf16.msra.mxu1 %v3619_v20 }
  0x76   :  { %2705 = vmatprep.subr.bf16.mxu0 %v4542_v21  ;;  %2725 = vmatprep.subr.bf16.mxu1 %v4542_v21 }
  0x77   :  { %2719 = vmatprep.mubr.msk.bf16.mxu0 %vm3565_vm3, %v4542_v21  ;;  %2739 = vmatprep.mubr.msk.bf16.mxu1 %vm3565_vm3, %v4542_v21 }
  0x79   :  { %2706 = vmatpush3.bf16.msra.mxu0 %v3625_v22  ;;  %2726 = vmatpush3.bf16.msra.mxu1 %v3629_v23 }
  0x7a   :  { %2707 = vmatprep.subr.bf16.mxu0 %v4542_v21  ;;  %2727 = vmatprep.subr.bf16.mxu1 %v4542_v21 }
  0x7d   :  { %2708 = vmatpush3.bf16.msra.mxu0 %v3638_v25  ;;  %2728 = vmatpush3.bf16.msra.mxu1 %v3642_v26 }
  0x7e   :  { %2709 = vmatprep.subr.bf16.mxu0 %v4542_v21  ;;  %2729 = vmatprep.subr.bf16.mxu1 %v4542_v21 }
  0x81   :  { %2710 = vmatpush3.bf16.msra.mxu0 %v3648_v27  ;;  %2730 = vmatpush3.bf16.msra.mxu1 %v3652_v28 }
  0x82   :  { %2711 = vmatprep.subr.bf16.mxu0 %v4542_v21  ;;  %2731 = vmatprep.subr.bf16.mxu1 %v4542_v21 }
  0x85   :  { %2712 = vmatpush3.bf16.msra.mxu0 %v3661_v30  ;;  %2732 = vmatpush3.bf16.msra.mxu1 %v3665_v31 }
  0x86   :  { %2713 = vmatprep.subr.bf16.mxu0 %v4542_v21  ;;  %2733 = vmatprep.subr.bf16.mxu1 %v4542_v21 }
  0x89   :  { %2714 = vmatpush3.bf16.msra.mxu0 %v3671_v32  ;;  %2734 = vmatpush3.bf16.msra.mxu1 %v3675_v33 }
  0x8a   :  { %2715 = vmatprep.subr.bf16.mxu0 %v4542_v21  ;;  %2735 = vmatprep.subr.bf16.mxu1 %v4542_v21 }
  0x8d   :  { %2716 = vmatpush3.bf16.msra.mxu0 %v3684_v35  ;;  %2736 = vmatpush3.bf16.msra.mxu1 %v3688_v36 }
  0x8e   :  { %2717 = vmatprep.subr.bf16.mxu0 %v4542_v21  ;;  %2737 = vmatprep.subr.bf16.mxu1 %v4542_v21 }
  0x91   :  { %2718 = vmatpush3.bf16.msra.mxu0 %v3694_v37  ;;  %2738 = vmatpush3.bf16.msra.mxu1 %v3698_v38 }
  0x92   :  { %2743 = vmatprep.subr.bf16.mxu0 %v4542_v21  ;;  %2763 = vmatprep.subr.bf16.mxu1 %v4542_v21 }
  0xf4   :  { %v3817_v62 = vpop.f32.mrf.mxu0  ;;  %v3819_v63 = vpop.f32.mrf.mxu1 }
  0xf6   :  { %v3823_v2 = vpop.f32.mrf.mxu0  ;;  %v3825_v3 = vpop.f32.mrf.mxu1 }
  0xf8   :  { %v225_v6 = vpop.f32.mrf.mxu0  ;;  %v298_v7 = vpop.f32.mrf.mxu1 }
  0xf9   :  { %v3834_v9 = vadd.f32 %v225_v6, %v3827_v4  ;;  %v3837_v10 = vadd.f32 %v298_v7, %v3821_v0 }
  0xfa   :  { %v227_v11 = vpop.f32.mrf.mxu0  ;;  %v300_v12 = vpop.f32.mrf.mxu1 }
  0xfb   :  { %v3840_v13 = vadd.f32 %v227_v11, %v3831_v8  ;;  %v3843_v14 = vadd.f32 %v300_v12, %v3829_v5 }
  0xfc   :  { %v231_v15 = vpop.f32.mrf.mxu0  ;;  %v304_v16 = vpop.f32.mrf.mxu1 }
  0xfd   :  { %v3846_v17 = vadd.f32 %v231_v15, %v3827_v4  ;;  %v3849_v18 = vadd.f32 %v304_v16, %v3821_v0 }
  0xfe   :  { %v233_v24 = vpop.f32.mrf.mxu0  ;;  %v306_v29 = vpop.f32.mrf.mxu1 }
  0xff   :  { %v3852_v34 = vadd.f32 %v233_v24, %v3831_v8  ;;  %v3855_v41 = vadd.f32 %v306_v29, %v3829_v5 }
 0x100   :  { %v235_v56 = vpop.f32.mrf.mxu0  ;;  %v308_v57 = vpop.f32.mrf.mxu1 }
 0x101   :  { %v3858_v58 = vadd.f32 %v235_v56, %v3827_v4  ;;  %v3861_v59 = vadd.f32 %v308_v57, %v3821_v0 }
 0x102   :  { %v237_v60 = vpop.f32.mrf.mxu0  ;;  %v310_v61 = vpop.f32.mrf.mxu1 }
 0x103   :  { %4544 = vst [vmem:[#allocation15_spill] sm:$0xff] %v3858_v58  ;;  %4545 = vst [vmem:[#allocation16_spill] sm:$0xff] %v3861_v59  ;;  %v3864_v1 = vadd.f32 %v237_v60, %v3831_v8  ;;  %v3867_v6 = vadd.f32 %v310_v61, %v3829_v5 }
 0x104   :  { %v241_v7 = vpop.f32.mrf.mxu0  ;;  %v314_v11 = vpop.f32.mrf.mxu1 }
 0x105   :  { %4546 = vst [vmem:[#allocation17_spill] sm:$0xff] %v3864_v1  ;;  %4547 = vst [vmem:[#allocation18_spill] sm:$0xff] %v3867_v6  ;;  %v3870_v12 = vadd.f32 %v241_v7, %v3827_v4  ;;  %v3873_v15 = vadd.f32 %v314_v11, %v3821_v0 }
 0x106   :  { %v243_v16 = vpop.f32.mrf.mxu0  ;;  %v316_v24 = vpop.f32.mrf.mxu1 }
 0x107   :  { %4548 = vst [vmem:[#allocation19_spill] sm:$0xff] %v3870_v12  ;;  %4549 = vst [vmem:[#allocation20_spill] sm:$0xff] %v3873_v15  ;;  %v3876_v29 = vadd.f32 %v243_v16, %v3831_v8  ;;  %v3879_v56 = vadd.f32 %v316_v24, %v3829_v5 }
 0x108   :  { %v245_v57 = vpop.f32.mrf.mxu0  ;;  %v318_v60 = vpop.f32.mrf.mxu1 }
 0x109   :  { %4550 = vst [vmem:[#allocation21_spill] sm:$0xff] %v3876_v29  ;;  %4551 = vst [vmem:[#allocation22_spill] sm:$0xff] %v3879_v56  ;;  %v3882_v61 = vadd.f32 %v245_v57, %v3827_v4  ;;  %v3885_v21 = vadd.f32 %v318_v60, %v3821_v0 }
 0x10a   :  { %v247_v7 = vpop.f32.mrf.mxu0  ;;  %v320_v12 = vpop.f32.mrf.mxu1 }
 0x10b   :  { %4552 = vst [vmem:[#allocation23_spill] sm:$0xff] %v3882_v61  ;;  %4553 = vst [vmem:[#allocation24_spill] sm:$0xff] %v3885_v21  ;;  %v3888_v11 = vadd.f32 %v247_v7, %v3831_v8  ;;  %v3891_v15 = vadd.f32 %v320_v12, %v3829_v5 }
 0x10c   :  { %v251_v16 = vpop.f32.mrf.mxu0  ;;  %v324_v29 = vpop.f32.mrf.mxu1 }
 0x10d   :  { %4554 = vst [vmem:[#allocation25_spill] sm:$0xff] %v3888_v11  ;;  %4555 = vst [vmem:[#allocation26_spill] sm:$0xff] %v3891_v15  ;;  %v3894_v24 = vadd.f32 %v251_v16, %v3827_v4  ;;  %v3897_v56 = vadd.f32 %v324_v29, %v3821_v0 }
 0x10e   :  { %v253_v57 = vpop.f32.mrf.mxu0  ;;  %v326_v61 = vpop.f32.mrf.mxu1 }
 0x10f   :  { %4556 = vst [vmem:[#allocation27_spill] sm:$0xff] %v3894_v24  ;;  %4557 = vst [vmem:[#allocation28_spill] sm:$0xff] %v3897_v56  ;;  %v3900_v60 = vadd.f32 %v253_v57, %v3831_v8  ;;  %v3903_v21 = vadd.f32 %v326_v61, %v3829_v5 }
 0x110   :  { %v255_v7 = vpop.f32.mrf.mxu0  ;;  %v328_v11 = vpop.f32.mrf.mxu1 }
 0x111   :  { %4558 = vst [vmem:[#allocation29_spill] sm:$0xff] %v3900_v60  ;;  %4559 = vst [vmem:[#allocation30_spill] sm:$0xff] %v3903_v21  ;;  %v3906_v12 = vadd.f32 %v255_v7, %v3827_v4  ;;  %v3909_v15 = vadd.f32 %v328_v11, %v3821_v0  ;;  %v224_v11 = vadd.f32 %v3823_v2, %v3831_v8 }
 0x112   :  { %v257_v16 = vpop.f32.mrf.mxu0  ;;  %v330_v24 = vpop.f32.mrf.mxu1  ;;  %v297_v2 = vadd.f32 %v3825_v3, %v3829_v5 }
 0x113   :  { %4560 = vst [vmem:[#allocation31_spill] sm:$0xff] %v3906_v12  ;;  %4561 = vst [vmem:[#allocation32_spill] sm:$0xff] %v3909_v15  ;;  %v3912_v29 = vadd.f32 %v257_v16, %v3831_v8  ;;  %v3915_v56 = vadd.f32 %v330_v24, %v3829_v5  ;;  %v222_v15 = vadd.f32 %v3817_v62, %v3827_v4 }
 0x114   :  { %v473_v57 = vpop.f32.mrf.mxu0  ;;  %v582_v60 = vpop.f32.mrf.mxu1  ;;  %v295_v24 = vadd.f32 %v3819_v63, %v3821_v0 }
 0x115   :  { %4562 = vst [vmem:[#allocation33_spill] sm:$0xff] %v3912_v29  ;;  %v588_v12 = vadd.f32 %v582_v60, %v224_v11  ;;  %v479_v16 = vadd.f32 %v473_v57, %v222_v15 }
 0x116   :  { %v2641_v61 = vpop.f32.mrf.mxu0  ;;  %v2661_v21 = vpop.f32.mrf.mxu1 }
 0x117   :  { %v589_v29 = vmul.f32 0.5, %v588_v12  ;;  %v480_v1 = vmul.f32 0.5, %v479_v16 }
 0x118   :  { %v476_v6 = vpop.f32.mrf.mxu0  ;;  %v585_v59 = vpop.f32.mrf.mxu1 }
 0x119   :  { %3357 = vtanh.f32 %v589_v29 }
 0x11a   :  { %v2642_v58 = vpop.f32.mrf.mxu0  ;;  %v2662_v7 = vpop.f32.mrf.mxu1  ;;  %3359 = vtanh.f32 %v480_v1 }
 0x126   :  { %v3358_v15 = vpop.eup %3357 }
 0x127   :  { %v3360_v29 = vpop.eup %3359  ;;  %v591_v1 = vmul.f32 0.5, %v3358_v15 }
 0x128   :  { %v482_v7 = vmul.f32 0.5, %v3360_v29 }
 0x129   :  { %v592_v63 = vadd.f32 0.5, %v591_v1 }
 0x12a   :  { %v483_v0 = vadd.f32 0.5, %v482_v7 }
 0x12b   :  { %v808_v16 = vmul.f32 0.0, %v592_v63 }
 0x134   :  { %v691_v21 = vpop.f32.mrf.mxu0  ;;  %v797_v6 = vpop.f32.mrf.mxu1 }
 0x135   :  { %v697_v59 = vadd.f32 %v691_v21, %v295_v24  ;;  %v803_v4 = vadd.f32 %v797_v6, %v297_v2  ;;  %v4563_v2 = vmov 0.0  }
 0x136   :  { %v2681_v58 = vpop.f32.mrf.mxu0  ;;  %v2701_v61 = vpop.f32.mrf.mxu1 }
 0x137   :  { %3361 = vtanh.f32 %v697_v59  ;;  %v804_v57 = vmul.f32 0.5, %v803_v4 }
 0x138   :  { %v694_v8 = vpop.f32.mrf.mxu0  ;;  %v800_v62 = vpop.f32.mrf.mxu1 }
 0x139   :  { %3363 = vtanh.f32 %v804_v57 }
 0x13a   :  { %v2682_v60 = vpop.f32.mrf.mxu0  ;;  %v2702_v12 = vpop.f32.mrf.mxu1 }
 0x144   :  { %v3362_v11 = vpop.eup %3361 }
 0x145   :  { %v809_v24 = vmul.f32 %v3362_v11, %v483_v0 }
 0x146   :  { %v3364_v3 = vpop.eup %3363 }
 0x147   :  { %v3925_v21 = vadd.f32 %v809_v24, %v808_v16  ;;  %v806_v5 = vmul.f32 0.5, %v3364_v3 }
 0x149   :  { %3365 = vtanh.f32 %v3925_v21  ;;  %v807_v6 = vadd.f32 0.5, %v806_v5 }
 0x156   :  { %v3366_v59 = vpop.eup %3365 }
 0x157   :  { %v812_v58 = vmul.f32 %v3366_v59, %v807_v6 }
 0x159   :  { %v820_v61 = vpack.c.bf16 %v812_v58, %v812_v58 }
 0x15b   :  { %2720 = vmatmul.mubr.bf16.vlgmr.msra.gmra.mxu0 %v820_v61  ;;  %2740 = vmatmul.mubr.bf16.vlgmr.msra.gmra.mxu1 %v820_v61 }
 0x15c   :  { %2744 = vmatpush3.bf16.msra.mxu0 %v3708_v39  ;;  %2764 = vmatpush3.bf16.msra.mxu1 %v3710_v40 }
 0x15d   :  { %2745 = vmatprep.subr.bf16.mxu0 %v4563_v2  ;;  %2765 = vmatprep.subr.bf16.mxu1 %v4563_v2 }
 0x15e   :  { %2759 = vmatprep.mubr.msk.bf16.mxu0 %vm3565_vm3, %v4563_v2  ;;  %2779 = vmatprep.mubr.msk.bf16.mxu1 %vm3565_vm3, %v4563_v2 }
 0x160   :  { %2746 = vmatpush3.bf16.msra.mxu0 %v3716_v42  ;;  %2766 = vmatpush3.bf16.msra.mxu1 %v3718_v43 }
 0x161   :  { %2747 = vmatprep.subr.bf16.mxu0 %v4563_v2  ;;  %2767 = vmatprep.subr.bf16.mxu1 %v4563_v2 }
 0x164   :  { %2748 = vmatpush3.bf16.msra.mxu0 %v3728_v44  ;;  %2768 = vmatpush3.bf16.msra.mxu1 %v3730_v45 }
 0x165   :  { %2749 = vmatprep.subr.bf16.mxu0 %v4563_v2  ;;  %2769 = vmatprep.subr.bf16.mxu1 %v4563_v2 }
 0x168   :  { %2750 = vmatpush3.bf16.msra.mxu0 %v3736_v46  ;;  %2770 = vmatpush3.bf16.msra.mxu1 %v3738_v47 }
 0x169   :  { %2751 = vmatprep.subr.bf16.mxu0 %v4563_v2  ;;  %2771 = vmatprep.subr.bf16.mxu1 %v4563_v2 }
 0x16c   :  { %2752 = vmatpush3.bf16.msra.mxu0 %v3744_v48  ;;  %2772 = vmatpush3.bf16.msra.mxu1 %v3746_v49 }
 0x16d   :  { %2753 = vmatprep.subr.bf16.mxu0 %v4563_v2  ;;  %2773 = vmatprep.subr.bf16.mxu1 %v4563_v2 }
 0x170   :  { %2754 = vmatpush3.bf16.msra.mxu0 %v3752_v50  ;;  %2774 = vmatpush3.bf16.msra.mxu1 %v3754_v51 }
 0x171   :  { %2755 = vmatprep.subr.bf16.mxu0 %v4563_v2  ;;  %2775 = vmatprep.subr.bf16.mxu1 %v4563_v2 }
 0x174   :  { %2756 = vmatpush3.bf16.msra.mxu0 %v3760_v52  ;;  %2776 = vmatpush3.bf16.msra.mxu1 %v3762_v53 }
 0x175   :  { %2757 = vmatprep.subr.bf16.mxu0 %v4563_v2  ;;  %2777 = vmatprep.subr.bf16.mxu1 %v4563_v2 }
 0x178   :  { %2758 = vmatpush3.bf16.msra.mxu0 %v3768_v54  ;;  %2778 = vmatpush3.bf16.msra.mxu1 %v3770_v55 }
 0x179   :  { %2783 = vmatprep.subr.bf16.mxu0 %v4563_v2  ;;  %2803 = vmatprep.subr.bf16.mxu1 %v4563_v2 }
 0x17b   :  { %2760 = vmatmul.mubr.bf16.vlgmr.msra.gmra.mxu0 %v820_v61  ;;  %2780 = vmatmul.mubr.bf16.vlgmr.msra.gmra.mxu1 %v820_v61 }
 0x17c   :  { %2784 = vmatpush3.bf16.msra.mxu0 %v3617_v19  ;;  %2804 = vmatpush3.bf16.msra.mxu1 %v3619_v20 }
 0x17d   :  { %2785 = vmatprep.subr.bf16.mxu0 %v4563_v2  ;;  %2805 = vmatprep.subr.bf16.mxu1 %v4563_v2 }
 0x17e   :  { %2799 = vmatprep.mubr.msk.bf16.mxu0 %vm3565_vm3, %v4563_v2  ;;  %2819 = vmatprep.mubr.msk.bf16.mxu1 %vm3565_vm3, %v4563_v2 }
 0x180   :  { %2786 = vmatpush3.bf16.msra.mxu0 %v3625_v22  ;;  %2806 = vmatpush3.bf16.msra.mxu1 %v3629_v23 }
 0x181   :  { %2787 = vmatprep.subr.bf16.mxu0 %v4563_v2  ;;  %2807 = vmatprep.subr.bf16.mxu1 %v4563_v2 }
 0x184   :  { %2788 = vmatpush3.bf16.msra.mxu0 %v3638_v25  ;;  %2808 = vmatpush3.bf16.msra.mxu1 %v3642_v26 }
 0x185   :  { %2789 = vmatprep.subr.bf16.mxu0 %v4563_v2  ;;  %2809 = vmatprep.subr.bf16.mxu1 %v4563_v2 }
 0x188   :  { %2790 = vmatpush3.bf16.msra.mxu0 %v3648_v27  ;;  %2810 = vmatpush3.bf16.msra.mxu1 %v3652_v28 }
 0x189   :  { %2791 = vmatprep.subr.bf16.mxu0 %v4563_v2  ;;  %2811 = vmatprep.subr.bf16.mxu1 %v4563_v2 }
 0x18c   :  { %2792 = vmatpush3.bf16.msra.mxu0 %v3661_v30  ;;  %2812 = vmatpush3.bf16.msra.mxu1 %v3665_v31 }
 0x18d   :  { %2793 = vmatprep.subr.bf16.mxu0 %v4563_v2  ;;  %2813 = vmatprep.subr.bf16.mxu1 %v4563_v2 }
 0x190   :  { %2794 = vmatpush3.bf16.msra.mxu0 %v3671_v32  ;;  %2814 = vmatpush3.bf16.msra.mxu1 %v3675_v33 }
 0x191   :  { %2795 = vmatprep.subr.bf16.mxu0 %v4563_v2  ;;  %2815 = vmatprep.subr.bf16.mxu1 %v4563_v2 }
 0x194   :  { %2796 = vmatpush3.bf16.msra.mxu0 %v3684_v35  ;;  %2816 = vmatpush3.bf16.msra.mxu1 %v3688_v36 }
 0x195   :  { %2797 = vmatprep.subr.bf16.mxu0 %v4563_v2  ;;  %2817 = vmatprep.subr.bf16.mxu1 %v4563_v2 }
 0x198   :  { %2798 = vmatpush3.bf16.msra.mxu0 %v3694_v37  ;;  %2818 = vmatpush3.bf16.msra.mxu1 %v3698_v38 }
 0x199   :  { %2823 = vmatprep.subr.bf16.mxu0 %v4563_v2  ;;  %2843 = vmatprep.subr.bf16.mxu1 %v4563_v2 }
 0x21b   :  { %v855_v8 = vpop.f32.mrf.mxu0  ;;  %v900_v62 = vpop.f32.mrf.mxu1 }
 0x21c   :  { %v906_v57 = vadd.f32 %v900_v62, %v3840_v13  ;;  %v861_v7 = vadd.f32 %v855_v8, %v3834_v9 }
 0x21d   :  { %v2721_v4 = vpop.f32.mrf.mxu0  ;;  %v2741_v15 = vpop.f32.mrf.mxu1 }
 0x21e   :  { %v907_v63 = vmul.f32 0.5, %v906_v57  ;;  %v862_v0 = vmul.f32 0.5, %v861_v7 }
 0x21f   :  { %v858_v60 = vpop.f32.mrf.mxu0  ;;  %v903_v12 = vpop.f32.mrf.mxu1 }
 0x220   :  { %3367 = vtanh.f32 %v907_v63 }
 0x221   :  { %v2722_v29 = vpop.f32.mrf.mxu0  ;;  %v2742_v1 = vpop.f32.mrf.mxu1  ;;  %3369 = vtanh.f32 %v862_v0 }
 0x22d   :  { %v3368_v61 = vpop.eup %3367 }
 0x22e   :  { %v3370_v62 = vpop.eup %3369  ;;  %v909_v9 = vmul.f32 0.5, %v3368_v61 }
 0x22f   :  { %v864_v15 = vmul.f32 0.5, %v3370_v62 }
 0x230   :  { %v910_v60 = vadd.f32 0.5, %v909_v9 }
 0x231   :  { %v865_v12 = vadd.f32 0.5, %v864_v15 }
 0x23b   :  { %v945_v11 = vpop.f32.mrf.mxu0  ;;  %v987_v16 = vpop.f32.mrf.mxu1 }
 0x23c   :  { %v951_v24 = vadd.f32 %v945_v11, %v3837_v10  ;;  %v993_v58 = vadd.f32 %v987_v16, %v3843_v14  ;;  %v998_v10 = vmul.f32 %v910_v60, %v3925_v21 }
 0x23d   :  { %v2761_v3 = vpop.f32.mrf.mxu0  ;;  %v2781_v5 = vpop.f32.mrf.mxu1 }
 0x23e   :  { %3371 = vtanh.f32 %v951_v24  ;;  %v994_v8 = vmul.f32 0.5, %v993_v58 }
 0x23f   :  { %v948_v6 = vpop.f32.mrf.mxu0  ;;  %v990_v59 = vpop.f32.mrf.mxu1 }
 0x240   :  { %3373 = vtanh.f32 %v994_v8 }
 0x241   :  { %v2762_v4 = vpop.f32.mrf.mxu0  ;;  %v2782_v13 = vpop.f32.mrf.mxu1 }
 0x24b   :  { %v3372_v29 = vpop.eup %3371 }
 0x24c   :  { %v999_v1 = vmul.f32 %v3372_v29, %v865_v12 }
 0x24d   :  { %v3374_v7 = vpop.eup %3373 }
 0x24e   :  { %v4005_v57 = vadd.f32 %v999_v1, %v998_v10  ;;  %v996_v14 = vmul.f32 0.5, %v3374_v7 }
 0x250   :  { %3375 = vtanh.f32 %v4005_v57  ;;  %v997_v63 = vadd.f32 0.5, %v996_v14 }
 0x25d   :  { %v3376_v0 = vpop.eup %3375 }
 0x25e   :  { %v1002_v11 = vmul.f32 %v3376_v0, %v997_v63 }
 0x260   :  { %v1010_v16 = vpack.c.bf16 %v1002_v11, %v1002_v11 }
 0x262   :  { %2800 = vmatmul.mubr.bf16.vlgmr.msra.gmra.mxu0 %v1010_v16  ;;  %2820 = vmatmul.mubr.bf16.vlgmr.msra.gmra.mxu1 %v1010_v16 }
 0x263   :  { %2824 = vmatpush3.bf16.msra.mxu0 %v3708_v39  ;;  %2844 = vmatpush3.bf16.msra.mxu1 %v3710_v40 }
 0x264   :  { %2825 = vmatprep.subr.bf16.mxu0 %v4563_v2  ;;  %2845 = vmatprep.subr.bf16.mxu1 %v4563_v2 }
 0x265   :  { %2839 = vmatprep.mubr.msk.bf16.mxu0 %vm3565_vm3, %v4563_v2  ;;  %2859 = vmatprep.mubr.msk.bf16.mxu1 %vm3565_vm3, %v4563_v2 }
 0x267   :  { %2826 = vmatpush3.bf16.msra.mxu0 %v3716_v42  ;;  %2846 = vmatpush3.bf16.msra.mxu1 %v3718_v43 }
 0x268   :  { %2827 = vmatprep.subr.bf16.mxu0 %v4563_v2  ;;  %2847 = vmatprep.subr.bf16.mxu1 %v4563_v2 }
 0x26b   :  { %2828 = vmatpush3.bf16.msra.mxu0 %v3728_v44  ;;  %2848 = vmatpush3.bf16.msra.mxu1 %v3730_v45 }
 0x26c   :  { %2829 = vmatprep.subr.bf16.mxu0 %v4563_v2  ;;  %2849 = vmatprep.subr.bf16.mxu1 %v4563_v2 }
 0x26f   :  { %2830 = vmatpush3.bf16.msra.mxu0 %v3736_v46  ;;  %2850 = vmatpush3.bf16.msra.mxu1 %v3738_v47 }
 0x270   :  { %2831 = vmatprep.subr.bf16.mxu0 %v4563_v2  ;;  %2851 = vmatprep.subr.bf16.mxu1 %v4563_v2 }
 0x273   :  { %2832 = vmatpush3.bf16.msra.mxu0 %v3744_v48  ;;  %2852 = vmatpush3.bf16.msra.mxu1 %v3746_v49 }
 0x274   :  { %2833 = vmatprep.subr.bf16.mxu0 %v4563_v2  ;;  %2853 = vmatprep.subr.bf16.mxu1 %v4563_v2 }
 0x277   :  { %2834 = vmatpush3.bf16.msra.mxu0 %v3752_v50  ;;  %2854 = vmatpush3.bf16.msra.mxu1 %v3754_v51 }
 0x278   :  { %2835 = vmatprep.subr.bf16.mxu0 %v4563_v2  ;;  %2855 = vmatprep.subr.bf16.mxu1 %v4563_v2 }
 0x27b   :  { %2836 = vmatpush3.bf16.msra.mxu0 %v3760_v52  ;;  %2856 = vmatpush3.bf16.msra.mxu1 %v3762_v53 }
 0x27c   :  { %2837 = vmatprep.subr.bf16.mxu0 %v4563_v2  ;;  %2857 = vmatprep.subr.bf16.mxu1 %v4563_v2 }
 0x27f   :  { %2838 = vmatpush3.bf16.msra.mxu0 %v3768_v54  ;;  %2858 = vmatpush3.bf16.msra.mxu1 %v3770_v55 }
 0x280   :  { %2863 = vmatprep.subr.bf16.mxu0 %v4563_v2  ;;  %2883 = vmatprep.subr.bf16.mxu1 %v4563_v2 }
 0x282   :  { %2840 = vmatmul.mubr.bf16.vlgmr.msra.gmra.mxu0 %v1010_v16  ;;  %2860 = vmatmul.mubr.bf16.vlgmr.msra.gmra.mxu1 %v1010_v16 }
 0x283   :  { %2864 = vmatpush3.bf16.msra.mxu0 %v3617_v19  ;;  %2884 = vmatpush3.bf16.msra.mxu1 %v3619_v20 }
 0x284   :  { %2865 = vmatprep.subr.bf16.mxu0 %v4563_v2  ;;  %2885 = vmatprep.subr.bf16.mxu1 %v4563_v2 }
 0x285   :  { %2879 = vmatprep.mubr.msk.bf16.mxu0 %vm3565_vm3, %v4563_v2  ;;  %2899 = vmatprep.mubr.msk.bf16.mxu1 %vm3565_vm3, %v4563_v2 }
 0x287   :  { %2866 = vmatpush3.bf16.msra.mxu0 %v3625_v22  ;;  %2886 = vmatpush3.bf16.msra.mxu1 %v3629_v23 }
 0x288   :  { %2867 = vmatprep.subr.bf16.mxu0 %v4563_v2  ;;  %2887 = vmatprep.subr.bf16.mxu1 %v4563_v2 }
 0x28b   :  { %2868 = vmatpush3.bf16.msra.mxu0 %v3638_v25  ;;  %2888 = vmatpush3.bf16.msra.mxu1 %v3642_v26 }
 0x28c   :  { %2869 = vmatprep.subr.bf16.mxu0 %v4563_v2  ;;  %2889 = vmatprep.subr.bf16.mxu1 %v4563_v2 }
 0x28f   :  { %2870 = vmatpush3.bf16.msra.mxu0 %v3648_v27  ;;  %2890 = vmatpush3.bf16.msra.mxu1 %v3652_v28 }
 0x290   :  { %2871 = vmatprep.subr.bf16.mxu0 %v4563_v2  ;;  %2891 = vmatprep.subr.bf16.mxu1 %v4563_v2 }
 0x293   :  { %2872 = vmatpush3.bf16.msra.mxu0 %v3661_v30  ;;  %2892 = vmatpush3.bf16.msra.mxu1 %v3665_v31 }
 0x294   :  { %2873 = vmatprep.subr.bf16.mxu0 %v4563_v2  ;;  %2893 = vmatprep.subr.bf16.mxu1 %v4563_v2 }
 0x297   :  { %2874 = vmatpush3.bf16.msra.mxu0 %v3671_v32  ;;  %2894 = vmatpush3.bf16.msra.mxu1 %v3675_v33 }
 0x298   :  { %2875 = vmatprep.subr.bf16.mxu0 %v4563_v2  ;;  %2895 = vmatprep.subr.bf16.mxu1 %v4563_v2 }
 0x29b   :  { %2876 = vmatpush3.bf16.msra.mxu0 %v3684_v35  ;;  %2896 = vmatpush3.bf16.msra.mxu1 %v3688_v36 }
 0x29c   :  { %2877 = vmatprep.subr.bf16.mxu0 %v4563_v2  ;;  %2897 = vmatprep.subr.bf16.mxu1 %v4563_v2 }
 0x29f   :  { %2878 = vmatpush3.bf16.msra.mxu0 %v3694_v37  ;;  %2898 = vmatpush3.bf16.msra.mxu1 %v3698_v38 }
 0x2a0   :  { %2903 = vmatprep.subr.bf16.mxu0 %v4563_v2  ;;  %2923 = vmatprep.subr.bf16.mxu1 %v4563_v2 }
 0x322   :  { %v1045_v19 = vpop.f32.mrf.mxu0  ;;  %v1090_v20 = vpop.f32.mrf.mxu1 }
 0x323   :  { %v1096_v30 = vadd.f32 %v1090_v20, %v3852_v34  ;;  %v1051_v31 = vadd.f32 %v1045_v19, %v3846_v17  ;;  %v4564_v20 = vld [vmem:[#allocation17_spill] sm:$0xff] }
 0x324   :  { %v2801_v22 = vpop.f32.mrf.mxu0  ;;  %v2821_v23 = vpop.f32.mrf.mxu1 }
 0x325   :  { %v1097_v32 = vmul.f32 0.5, %v1096_v30  ;;  %v1052_v33 = vmul.f32 0.5, %v1051_v31  ;;  %v4565_v23 = vld [vmem:[#allocation15_spill] sm:$0xff]  ;;  %v4566_v31 = vld [vmem:[#allocation16_spill] sm:$0xff] }
 0x326   :  { %v1048_v25 = vpop.f32.mrf.mxu0  ;;  %v1093_v26 = vpop.f32.mrf.mxu1 }
 0x327   :  { %3377 = vtanh.f32 %v1097_v32 }
 0x328   :  { %v2802_v27 = vpop.f32.mrf.mxu0  ;;  %v2822_v28 = vpop.f32.mrf.mxu1  ;;  %3379 = vtanh.f32 %v1052_v33 }
 0x334   :  { %v3378_v6 = vpop.eup %3377 }
 0x335   :  { %v3380_v58 = vpop.eup %3379  ;;  %v1099_v17 = vmul.f32 0.5, %v3378_v6 }
 0x336   :  { %v1054_v4 = vmul.f32 0.5, %v3380_v58 }
 0x337   :  { %v1100_v13 = vadd.f32 0.5, %v1099_v17 }
 0x338   :  { %v1055_v62 = vadd.f32 0.5, %v1054_v4 }
 0x342   :  { %v1135_v35 = vpop.f32.mrf.mxu0  ;;  %v1177_v36 = vpop.f32.mrf.mxu1 }
 0x343   :  { %v1141_v37 = vadd.f32 %v1135_v35, %v3849_v18  ;;  %v1183_v5 = vadd.f32 %v1177_v36, %v3855_v41  ;;  %v1188_v18 = vmul.f32 %v1100_v13, %v4005_v57 }
 0x344   :  { %v2841_v38 = vpop.f32.mrf.mxu0  ;;  %v2861_v21 = vpop.f32.mrf.mxu1 }
 0x345   :  { %3381 = vtanh.f32 %v1141_v37  ;;  %v1184_v61 = vmul.f32 0.5, %v1183_v5  ;;  %v4567_v38 = vld [vmem:[#allocation18_spill] sm:$0xff] }
 0x346   :  { %v1138_v24 = vpop.f32.mrf.mxu0  ;;  %v1180_v3 = vpop.f32.mrf.mxu1 }
 0x347   :  { %3383 = vtanh.f32 %v1184_v61 }
 0x348   :  { %v2842_v59 = vpop.f32.mrf.mxu0  ;;  %v2862_v34 = vpop.f32.mrf.mxu1 }
 0x352   :  { %v3382_v9 = vpop.eup %3381 }
 0x353   :  { %v1189_v8 = vmul.f32 %v3382_v9, %v1055_v62 }
 0x354   :  { %v3384_v60 = vpop.eup %3383 }
 0x355   :  { %v4085_v15 = vadd.f32 %v1189_v8, %v1188_v18  ;;  %v1186_v41 = vmul.f32 0.5, %v3384_v60 }
 0x357   :  { %3385 = vtanh.f32 %v4085_v15  ;;  %v1187_v12 = vadd.f32 0.5, %v1186_v41 }
 0x364   :  { %v3386_v29 = vpop.eup %3385 }
 0x365   :  { %v1192_v10 = vmul.f32 %v3386_v29, %v1187_v12 }
 0x367   :  { %v1200_v1 = vpack.c.bf16 %v1192_v10, %v1192_v10  ;;  %v4200_v10 = vld [vmem:[#allocation8 + $0xe8] ss:$16 sps:$4 sm:$0xff]  }
 0x369   :  { %2880 = vmatmul.mubr.bf16.vlgmr.msra.gmra.mxu0 %v1200_v1  ;;  %2900 = vmatmul.mubr.bf16.vlgmr.msra.gmra.mxu1 %v1200_v1 }
 0x36a   :  { %2904 = vmatpush3.bf16.msra.mxu0 %v3708_v39  ;;  %2924 = vmatpush3.bf16.msra.mxu1 %v3710_v40  ;;  %v4124_v39 = vld [vmem:[#allocation8 + $0xe0] ss:$16 sps:$4 sm:$0xff]   ;;  %v4127_v40 = vld [vmem:[#allocation8 + $0xe4] ss:$16 sps:$4 sm:$0xff]  }
 0x36b   :  { %2905 = vmatprep.subr.bf16.mxu0 %v4563_v2  ;;  %2925 = vmatprep.subr.bf16.mxu1 %v4563_v2 }
 0x36c   :  { %2919 = vmatprep.mubr.msk.bf16.mxu0 %vm3565_vm3, %v4563_v2  ;;  %2939 = vmatprep.mubr.msk.bf16.mxu1 %vm3565_vm3, %v4563_v2 }
 0x36e   :  { %2906 = vmatpush3.bf16.msra.mxu0 %v3716_v42  ;;  %2926 = vmatpush3.bf16.msra.mxu1 %v3718_v43  ;;  %v4136_v42 = vld [vmem:[#allocation8 + $0xc0] ss:$16 sps:$4 sm:$0xff]   ;;  %v4139_v43 = vld [vmem:[#allocation8 + $0xc4] ss:$16 sps:$4 sm:$0xff]  }
 0x36f   :  { %2907 = vmatprep.subr.bf16.mxu0 %v4563_v2  ;;  %2927 = vmatprep.subr.bf16.mxu1 %v4563_v2 }
 0x372   :  { %2908 = vmatpush3.bf16.msra.mxu0 %v3728_v44  ;;  %2928 = vmatpush3.bf16.msra.mxu1 %v3730_v45  ;;  %v4144_v44 = vld [vmem:[#allocation8 + $0xa0] ss:$16 sps:$4 sm:$0xff]   ;;  %v4147_v45 = vld [vmem:[#allocation8 + $0xa4] ss:$16 sps:$4 sm:$0xff]  }
 0x373   :  { %2909 = vmatprep.subr.bf16.mxu0 %v4563_v2  ;;  %2929 = vmatprep.subr.bf16.mxu1 %v4563_v2 }
 0x376   :  { %2910 = vmatpush3.bf16.msra.mxu0 %v3736_v46  ;;  %2930 = vmatpush3.bf16.msra.mxu1 %v3738_v47  ;;  %v4152_v46 = vld [vmem:[#allocation8 + $0x80] ss:$16 sps:$4 sm:$0xff]   ;;  %v4155_v47 = vld [vmem:[#allocation8 + $0x84] ss:$16 sps:$4 sm:$0xff]  }
 0x377   :  { %2911 = vmatprep.subr.bf16.mxu0 %v4563_v2  ;;  %2931 = vmatprep.subr.bf16.mxu1 %v4563_v2 }
 0x37a   :  { %2912 = vmatpush3.bf16.msra.mxu0 %v3744_v48  ;;  %2932 = vmatpush3.bf16.msra.mxu1 %v3746_v49  ;;  %v4160_v48 = vld [vmem:[#allocation8 + $0x60] ss:$16 sps:$4 sm:$0xff]   ;;  %v4163_v49 = vld [vmem:[#allocation8 + $0x64] ss:$16 sps:$4 sm:$0xff]  }
 0x37b   :  { %2913 = vmatprep.subr.bf16.mxu0 %v4563_v2  ;;  %2933 = vmatprep.subr.bf16.mxu1 %v4563_v2 }
 0x37e   :  { %2914 = vmatpush3.bf16.msra.mxu0 %v3752_v50  ;;  %2934 = vmatpush3.bf16.msra.mxu1 %v3754_v51  ;;  %v4168_v50 = vld [vmem:[#allocation8 + $0x40] ss:$16 sps:$4 sm:$0xff]   ;;  %v4171_v51 = vld [vmem:[#allocation8 + $0x44] ss:$16 sps:$4 sm:$0xff]  }
 0x37f   :  { %2915 = vmatprep.subr.bf16.mxu0 %v4563_v2  ;;  %2935 = vmatprep.subr.bf16.mxu1 %v4563_v2 }
 0x382   :  { %2916 = vmatpush3.bf16.msra.mxu0 %v3760_v52  ;;  %2936 = vmatpush3.bf16.msra.mxu1 %v3762_v53  ;;  %v4176_v52 = vld [vmem:[#allocation8 + $0x20] ss:$16 sps:$4 sm:$0xff]   ;;  %v4179_v53 = vld [vmem:[#allocation8 + $0x24] ss:$16 sps:$4 sm:$0xff]  }
 0x383   :  { %2917 = vmatprep.subr.bf16.mxu0 %v4563_v2  ;;  %2937 = vmatprep.subr.bf16.mxu1 %v4563_v2 }
 0x386   :  { %2918 = vmatpush3.bf16.msra.mxu0 %v3768_v54  ;;  %2938 = vmatpush3.bf16.msra.mxu1 %v3770_v55  ;;  %v4184_v54 = vld [vmem:[#allocation8] ss:$16 sps:$4 sm:$0xff]   ;;  %v4187_v55 = vld [vmem:[#allocation8 + $0x4] ss:$16 sps:$4 sm:$0xff]  }
 0x387   :  { %2943 = vmatprep.subr.bf16.mxu0 %v4563_v2  ;;  %2963 = vmatprep.subr.bf16.mxu1 %v4563_v2 }
 0x389   :  { %2920 = vmatmul.mubr.bf16.vlgmr.msra.gmra.mxu0 %v1200_v1  ;;  %2940 = vmatmul.mubr.bf16.vlgmr.msra.gmra.mxu1 %v1200_v1  ;;  %v4203_v1 = vld [vmem:[#allocation8 + $0xec] ss:$16 sps:$4 sm:$0xff]  }
 0x38a   :  { %2944 = vmatpush3.bf16.msra.mxu0 %v4124_v39  ;;  %2964 = vmatpush3.bf16.msra.mxu1 %v4127_v40 }
 0x38b   :  { %2945 = vmatprep.subr.bf16.mxu0 %v4563_v2  ;;  %2965 = vmatprep.subr.bf16.mxu1 %v4563_v2 }
 0x38c   :  { %2959 = vmatprep.mubr.msk.bf16.mxu0 %vm3565_vm3, %v4563_v2  ;;  %2979 = vmatprep.mubr.msk.bf16.mxu1 %vm3565_vm3, %v4563_v2 }
 0x38e   :  { %2946 = vmatpush3.bf16.msra.mxu0 %v4136_v42  ;;  %2966 = vmatpush3.bf16.msra.mxu1 %v4139_v43 }
 0x38f   :  { %2947 = vmatprep.subr.bf16.mxu0 %v4563_v2  ;;  %2967 = vmatprep.subr.bf16.mxu1 %v4563_v2 }
 0x392   :  { %2948 = vmatpush3.bf16.msra.mxu0 %v4144_v44  ;;  %2968 = vmatpush3.bf16.msra.mxu1 %v4147_v45 }
 0x393   :  { %2949 = vmatprep.subr.bf16.mxu0 %v4563_v2  ;;  %2969 = vmatprep.subr.bf16.mxu1 %v4563_v2 }
 0x396   :  { %2950 = vmatpush3.bf16.msra.mxu0 %v4152_v46  ;;  %2970 = vmatpush3.bf16.msra.mxu1 %v4155_v47 }
 0x397   :  { %2951 = vmatprep.subr.bf16.mxu0 %v4563_v2  ;;  %2971 = vmatprep.subr.bf16.mxu1 %v4563_v2 }
 0x39a   :  { %2952 = vmatpush3.bf16.msra.mxu0 %v4160_v48  ;;  %2972 = vmatpush3.bf16.msra.mxu1 %v4163_v49 }
 0x39b   :  { %2953 = vmatprep.subr.bf16.mxu0 %v4563_v2  ;;  %2973 = vmatprep.subr.bf16.mxu1 %v4563_v2 }
 0x39e   :  { %2954 = vmatpush3.bf16.msra.mxu0 %v4168_v50  ;;  %2974 = vmatpush3.bf16.msra.mxu1 %v4171_v51 }
 0x39f   :  { %2955 = vmatprep.subr.bf16.mxu0 %v4563_v2  ;;  %2975 = vmatprep.subr.bf16.mxu1 %v4563_v2 }
 0x3a2   :  { %2956 = vmatpush3.bf16.msra.mxu0 %v4176_v52  ;;  %2976 = vmatpush3.bf16.msra.mxu1 %v4179_v53 }
 0x3a3   :  { %2957 = vmatprep.subr.bf16.mxu0 %v4563_v2  ;;  %2977 = vmatprep.subr.bf16.mxu1 %v4563_v2 }
 0x3a6   :  { %2958 = vmatpush3.bf16.msra.mxu0 %v4184_v54  ;;  %2978 = vmatpush3.bf16.msra.mxu1 %v4187_v55 }
 0x3a7   :  { %2983 = vmatprep.subr.bf16.mxu0 %v4563_v2  ;;  %3003 = vmatprep.subr.bf16.mxu1 %v4563_v2 }
 0x429   :  { %v1235_v57 = vpop.f32.mrf.mxu0  ;;  %v1280_v7 = vpop.f32.mrf.mxu1 }
 0x42a   :  { %v1286_v22 = vadd.f32 %v1280_v7, %v4564_v20  ;;  %v1241_v25 = vadd.f32 %v1235_v57, %v4565_v23  ;;  %v4215_v57 = vld [vmem:[#allocation8 + $0xcc] ss:$16 sps:$4 sm:$0xff]   ;;  %v4220_v7 = vld [vmem:[#allocation8 + $0xa8] ss:$16 sps:$4 sm:$0xff]  }
 0x42b   :  { %v2881_v14 = vpop.f32.mrf.mxu0  ;;  %v2901_v63 = vpop.f32.mrf.mxu1  ;;  %v4247_v20 = vld [vmem:[#allocation8 + $0x4c] ss:$16 sps:$4 sm:$0xff]  }
 0x42c   :  { %v1287_v26 = vmul.f32 0.5, %v1286_v22  ;;  %v1242_v27 = vmul.f32 0.5, %v1241_v25  ;;  %v4223_v14 = vld [vmem:[#allocation8 + $0xac] ss:$16 sps:$4 sm:$0xff]   ;;  %v4228_v63 = vld [vmem:[#allocation8 + $0x88] ss:$16 sps:$4 sm:$0xff]  }
 0x42d   :  { %v1238_v0 = vpop.f32.mrf.mxu0  ;;  %v1283_v11 = vpop.f32.mrf.mxu1  ;;  %v4252_v22 = vld [vmem:[#allocation8 + $0x28] ss:$16 sps:$4 sm:$0xff]   ;;  %v4255_v23 = vld [vmem:[#allocation8 + $0x2c] ss:$16 sps:$4 sm:$0xff]  }
 0x42e   :  { %3387 = vtanh.f32 %v1287_v26  ;;  %v4231_v0 = vld [vmem:[#allocation8 + $0x8c] ss:$16 sps:$4 sm:$0xff]   ;;  %v4236_v11 = vld [vmem:[#allocation8 + $0x68] ss:$16 sps:$4 sm:$0xff]  }
 0x42f   :  { %v2882_v16 = vpop.f32.mrf.mxu0  ;;  %v2902_v19 = vpop.f32.mrf.mxu1  ;;  %3389 = vtanh.f32 %v1242_v27  ;;  %v4260_v25 = vld [vmem:[#allocation8 + $0x8] ss:$16 sps:$4 sm:$0xff]   ;;  %v4263_v26 = vld [vmem:[#allocation8 + $0xc] ss:$16 sps:$4 sm:$0xff]  }
 0x430   :  { %v4239_v16 = vld [vmem:[#allocation8 + $0x6c] ss:$16 sps:$4 sm:$0xff]   ;;  %v4244_v19 = vld [vmem:[#allocation8 + $0x48] ss:$16 sps:$4 sm:$0xff]  }
 0x43b   :  { %v3388_v24 = vpop.eup %3387 }
 0x43c   :  { %v3390_v6 = vpop.eup %3389  ;;  %v1289_v59 = vmul.f32 0.5, %v3388_v24 }
 0x43d   :  { %v1244_v58 = vmul.f32 0.5, %v3390_v6 }
 0x43e   :  { %v1290_v17 = vadd.f32 0.5, %v1289_v59 }
 0x43f   :  { %v1245_v61 = vadd.f32 0.5, %v1244_v58 }
 0x440   :  { %v1378_v13 = vmul.f32 %v1290_v17, %v4085_v15  ;;  %v4212_v15 = vld [vmem:[#allocation8 + $0xc8] ss:$16 sps:$4 sm:$0xff]  }
 0x449   :  { %v1325_v28 = vpop.f32.mrf.mxu0  ;;  %v1367_v30 = vpop.f32.mrf.mxu1 }
 0x44a   :  { %v1331_v32 = vadd.f32 %v1325_v28, %v4566_v31  ;;  %v1373_v21 = vadd.f32 %v1367_v30, %v4567_v38 }
 0x44b   :  { %v2921_v33 = vpop.f32.mrf.mxu0  ;;  %v2941_v35 = vpop.f32.mrf.mxu1 }
 0x44c   :  { %3391 = vtanh.f32 %v1331_v32  ;;  %v1374_v34 = vmul.f32 0.5, %v1373_v21  ;;  %v4569_v21 = vld [vmem:[#allocation19_spill] sm:$0xff] }
 0x44d   :  { %v1328_v36 = vpop.f32.mrf.mxu0  ;;  %v1370_v37 = vpop.f32.mrf.mxu1 }
 0x44e   :  { %3393 = vtanh.f32 %v1374_v34  ;;  %v4568_v37 = vld [vmem:[#allocation21_spill] sm:$0xff]  ;;  %v4570_v34 = vld [vmem:[#allocation20_spill] sm:$0xff] }
 0x44f   :  { %v2922_v3 = vpop.f32.mrf.mxu0  ;;  %v2942_v5 = vpop.f32.mrf.mxu1 }
 0x459   :  { %v3392_v4 = vpop.eup %3391 }
 0x45a   :  { %v1379_v62 = vmul.f32 %v3392_v4, %v1245_v61 }
 0x45b   :  { %v3394_v18 = vpop.eup %3393 }
 0x45c   :  { %v4197_v9 = vadd.f32 %v1379_v62, %v1378_v13  ;;  %v1376_v8 = vmul.f32 0.5, %v3394_v18  ;;  %v4571_v62 = vld [vmem:[#allocation22_spill] sm:$0xff] }
 0x45e   :  { %3395 = vtanh.f32 %v4197_v9  ;;  %v1377_v60 = vadd.f32 0.5, %v1376_v8 }
 0x46b   :  { %v3396_v41 = vpop.eup %3395 }
 0x46c   :  { %v1382_v12 = vmul.f32 %v3396_v41, %v1377_v60 }
 0x46e   :  { %v1390_v29 = vpack.c.bf16 %v1382_v12, %v1382_v12 }
 0x470   :  { %2960 = vmatmul.mubr.bf16.vlgmr.msra.gmra.mxu0 %v1390_v29  ;;  %2980 = vmatmul.mubr.bf16.vlgmr.msra.gmra.mxu1 %v1390_v29 }
 0x471   :  { %2984 = vmatpush3.bf16.msra.mxu0 %v4200_v10  ;;  %3004 = vmatpush3.bf16.msra.mxu1 %v4203_v1 }
 0x472   :  { %2985 = vmatprep.subr.bf16.mxu0 %v4563_v2  ;;  %3005 = vmatprep.subr.bf16.mxu1 %v4563_v2 }
 0x473   :  { %2999 = vmatprep.mubr.msk.bf16.mxu0 %vm3565_vm3, %v4563_v2  ;;  %3019 = vmatprep.mubr.msk.bf16.mxu1 %vm3565_vm3, %v4563_v2 }
 0x475   :  { %2986 = vmatpush3.bf16.msra.mxu0 %v4212_v15  ;;  %3006 = vmatpush3.bf16.msra.mxu1 %v4215_v57 }
 0x476   :  { %2987 = vmatprep.subr.bf16.mxu0 %v4563_v2  ;;  %3007 = vmatprep.subr.bf16.mxu1 %v4563_v2 }
 0x479   :  { %2988 = vmatpush3.bf16.msra.mxu0 %v4220_v7  ;;  %3008 = vmatpush3.bf16.msra.mxu1 %v4223_v14 }
 0x47a   :  { %2989 = vmatprep.subr.bf16.mxu0 %v4563_v2  ;;  %3009 = vmatprep.subr.bf16.mxu1 %v4563_v2 }
 0x47d   :  { %2990 = vmatpush3.bf16.msra.mxu0 %v4228_v63  ;;  %3010 = vmatpush3.bf16.msra.mxu1 %v4231_v0 }
 0x47e   :  { %2991 = vmatprep.subr.bf16.mxu0 %v4563_v2  ;;  %3011 = vmatprep.subr.bf16.mxu1 %v4563_v2 }
 0x481   :  { %2992 = vmatpush3.bf16.msra.mxu0 %v4236_v11  ;;  %3012 = vmatpush3.bf16.msra.mxu1 %v4239_v16 }
 0x482   :  { %2993 = vmatprep.subr.bf16.mxu0 %v4563_v2  ;;  %3013 = vmatprep.subr.bf16.mxu1 %v4563_v2 }
 0x485   :  { %2994 = vmatpush3.bf16.msra.mxu0 %v4244_v19  ;;  %3014 = vmatpush3.bf16.msra.mxu1 %v4247_v20 }
 0x486   :  { %2995 = vmatprep.subr.bf16.mxu0 %v4563_v2  ;;  %3015 = vmatprep.subr.bf16.mxu1 %v4563_v2 }
 0x489   :  { %2996 = vmatpush3.bf16.msra.mxu0 %v4252_v22  ;;  %3016 = vmatpush3.bf16.msra.mxu1 %v4255_v23 }
 0x48a   :  { %2997 = vmatprep.subr.bf16.mxu0 %v4563_v2  ;;  %3017 = vmatprep.subr.bf16.mxu1 %v4563_v2 }
 0x48d   :  { %2998 = vmatpush3.bf16.msra.mxu0 %v4260_v25  ;;  %3018 = vmatpush3.bf16.msra.mxu1 %v4263_v26 }
 0x48e   :  { %3023 = vmatprep.subr.bf16.mxu0 %v4563_v2  ;;  %3043 = vmatprep.subr.bf16.mxu1 %v4563_v2 }
 0x490   :  { %3000 = vmatmul.mubr.bf16.vlgmr.msra.gmra.mxu0 %v1390_v29  ;;  %3020 = vmatmul.mubr.bf16.vlgmr.msra.gmra.mxu1 %v1390_v29 }
 0x491   :  { %3024 = vmatpush3.bf16.msra.mxu0 %v4124_v39  ;;  %3044 = vmatpush3.bf16.msra.mxu1 %v4127_v40 }
 0x492   :  { %3025 = vmatprep.subr.bf16.mxu0 %v4563_v2  ;;  %3045 = vmatprep.subr.bf16.mxu1 %v4563_v2 }
 0x493   :  { %3039 = vmatprep.mubr.msk.bf16.mxu0 %vm3565_vm3, %v4563_v2  ;;  %3059 = vmatprep.mubr.msk.bf16.mxu1 %vm3565_vm3, %v4563_v2 }
 0x495   :  { %3026 = vmatpush3.bf16.msra.mxu0 %v4136_v42  ;;  %3046 = vmatpush3.bf16.msra.mxu1 %v4139_v43 }
 0x496   :  { %3027 = vmatprep.subr.bf16.mxu0 %v4563_v2  ;;  %3047 = vmatprep.subr.bf16.mxu1 %v4563_v2 }
 0x499   :  { %3028 = vmatpush3.bf16.msra.mxu0 %v4144_v44  ;;  %3048 = vmatpush3.bf16.msra.mxu1 %v4147_v45 }
 0x49a   :  { %3029 = vmatprep.subr.bf16.mxu0 %v4563_v2  ;;  %3049 = vmatprep.subr.bf16.mxu1 %v4563_v2 }
 0x49d   :  { %3030 = vmatpush3.bf16.msra.mxu0 %v4152_v46  ;;  %3050 = vmatpush3.bf16.msra.mxu1 %v4155_v47 }
 0x49e   :  { %3031 = vmatprep.subr.bf16.mxu0 %v4563_v2  ;;  %3051 = vmatprep.subr.bf16.mxu1 %v4563_v2 }
 0x4a1   :  { %3032 = vmatpush3.bf16.msra.mxu0 %v4160_v48  ;;  %3052 = vmatpush3.bf16.msra.mxu1 %v4163_v49 }
 0x4a2   :  { %3033 = vmatprep.subr.bf16.mxu0 %v4563_v2  ;;  %3053 = vmatprep.subr.bf16.mxu1 %v4563_v2 }
 0x4a5   :  { %3034 = vmatpush3.bf16.msra.mxu0 %v4168_v50  ;;  %3054 = vmatpush3.bf16.msra.mxu1 %v4171_v51 }
 0x4a6   :  { %3035 = vmatprep.subr.bf16.mxu0 %v4563_v2  ;;  %3055 = vmatprep.subr.bf16.mxu1 %v4563_v2 }
 0x4a9   :  { %3036 = vmatpush3.bf16.msra.mxu0 %v4176_v52  ;;  %3056 = vmatpush3.bf16.msra.mxu1 %v4179_v53 }
 0x4aa   :  { %3037 = vmatprep.subr.bf16.mxu0 %v4563_v2  ;;  %3057 = vmatprep.subr.bf16.mxu1 %v4563_v2 }
 0x4ad   :  { %3038 = vmatpush3.bf16.msra.mxu0 %v4184_v54  ;;  %3058 = vmatpush3.bf16.msra.mxu1 %v4187_v55 }
 0x4ae   :  { %3063 = vmatprep.subr.bf16.mxu0 %v4563_v2  ;;  %3083 = vmatprep.subr.bf16.mxu1 %v4563_v2 }
 0x530   :  { %v1425_v27 = vpop.f32.mrf.mxu0  ;;  %v1470_v28 = vpop.f32.mrf.mxu1 }
 0x531   :  { %v1476_v38 = vadd.f32 %v1470_v28, %v4568_v37  ;;  %v1431_v24 = vadd.f32 %v1425_v27, %v4569_v21 }
 0x532   :  { %v2961_v30 = vpop.f32.mrf.mxu0  ;;  %v2981_v31 = vpop.f32.mrf.mxu1 }
 0x533   :  { %v1477_v3 = vmul.f32 0.5, %v1476_v38  ;;  %v1432_v5 = vmul.f32 0.5, %v1431_v24 }
 0x534   :  { %v1428_v32 = vpop.f32.mrf.mxu0  ;;  %v1473_v33 = vpop.f32.mrf.mxu1 }
 0x535   :  { %3397 = vtanh.f32 %v1477_v3 }
 0x536   :  { %v2962_v35 = vpop.f32.mrf.mxu0  ;;  %v2982_v36 = vpop.f32.mrf.mxu1  ;;  %3399 = vtanh.f32 %v1432_v5 }
 0x542   :  { %v3398_v8 = vpop.eup %3397 }
 0x543   :  { %v3400_v12 = vpop.eup %3399  ;;  %v1479_v29 = vmul.f32 0.5, %v3398_v8 }
 0x544   :  { %v1434_v28 = vmul.f32 0.5, %v3400_v12 }
 0x545   :  { %v1480_v30 = vadd.f32 0.5, %v1479_v29 }
 0x546   :  { %v1435_v31 = vadd.f32 0.5, %v1434_v28 }
 0x547   :  { %v1568_v33 = vmul.f32 %v1480_v30, %v4197_v9 }
 0x550   :  { %v1515_v6 = vpop.f32.mrf.mxu0  ;;  %v1557_v59 = vpop.f32.mrf.mxu1 }
 0x551   :  { %v1521_v58 = vadd.f32 %v1515_v6, %v4570_v34  ;;  %v1563_v18 = vadd.f32 %v1557_v59, %v4571_v62 }
 0x552   :  { %v3001_v17 = vpop.f32.mrf.mxu0  ;;  %v3021_v61 = vpop.f32.mrf.mxu1 }
 0x553   :  { %3401 = vtanh.f32 %v1521_v58  ;;  %v1564_v27 = vmul.f32 0.5, %v1563_v18  ;;  %v4573_v18 = vld [vmem:[#allocation23_spill] sm:$0xff] }
 0x554   :  { %v1518_v4 = vpop.f32.mrf.mxu0  ;;  %v1560_v13 = vpop.f32.mrf.mxu1 }
 0x555   :  { %3403 = vtanh.f32 %v1564_v27  ;;  %v4572_v13 = vld [vmem:[#allocation25_spill] sm:$0xff]  ;;  %v4574_v27 = vld [vmem:[#allocation24_spill] sm:$0xff] }
 0x556   :  { %v3002_v60 = vpop.f32.mrf.mxu0  ;;  %v3022_v41 = vpop.f32.mrf.mxu1 }
 0x560   :  { %v3402_v32 = vpop.eup %3401 }
 0x561   :  { %v1569_v35 = vmul.f32 %v3402_v32, %v1435_v31 }
 0x562   :  { %v3404_v37 = vpop.eup %3403 }
 0x563   :  { %v4309_v36 = vadd.f32 %v1569_v35, %v1568_v33  ;;  %v1566_v38 = vmul.f32 0.5, %v3404_v37  ;;  %v4575_v35 = vld [vmem:[#allocation26_spill] sm:$0xff] }
 0x565   :  { %3405 = vtanh.f32 %v4309_v36  ;;  %v1567_v21 = vadd.f32 0.5, %v1566_v38 }
 0x572   :  { %v3406_v24 = vpop.eup %3405 }
 0x573   :  { %v1572_v3 = vmul.f32 %v3406_v24, %v1567_v21 }
 0x575   :  { %v1580_v5 = vpack.c.bf16 %v1572_v3, %v1572_v3 }
 0x577   :  { %3040 = vmatmul.mubr.bf16.vlgmr.msra.gmra.mxu0 %v1580_v5  ;;  %3060 = vmatmul.mubr.bf16.vlgmr.msra.gmra.mxu1 %v1580_v5 }
 0x578   :  { %3064 = vmatpush3.bf16.msra.mxu0 %v4200_v10  ;;  %3084 = vmatpush3.bf16.msra.mxu1 %v4203_v1 }
 0x579   :  { %3065 = vmatprep.subr.bf16.mxu0 %v4563_v2  ;;  %3085 = vmatprep.subr.bf16.mxu1 %v4563_v2 }
 0x57a   :  { %3079 = vmatprep.mubr.msk.bf16.mxu0 %vm3565_vm3, %v4563_v2  ;;  %3099 = vmatprep.mubr.msk.bf16.mxu1 %vm3565_vm3, %v4563_v2 }
 0x57c   :  { %3066 = vmatpush3.bf16.msra.mxu0 %v4212_v15  ;;  %3086 = vmatpush3.bf16.msra.mxu1 %v4215_v57 }
 0x57d   :  { %3067 = vmatprep.subr.bf16.mxu0 %v4563_v2  ;;  %3087 = vmatprep.subr.bf16.mxu1 %v4563_v2 }
 0x580   :  { %3068 = vmatpush3.bf16.msra.mxu0 %v4220_v7  ;;  %3088 = vmatpush3.bf16.msra.mxu1 %v4223_v14 }
 0x581   :  { %3069 = vmatprep.subr.bf16.mxu0 %v4563_v2  ;;  %3089 = vmatprep.subr.bf16.mxu1 %v4563_v2 }
 0x584   :  { %3070 = vmatpush3.bf16.msra.mxu0 %v4228_v63  ;;  %3090 = vmatpush3.bf16.msra.mxu1 %v4231_v0 }
 0x585   :  { %3071 = vmatprep.subr.bf16.mxu0 %v4563_v2  ;;  %3091 = vmatprep.subr.bf16.mxu1 %v4563_v2 }
 0x588   :  { %3072 = vmatpush3.bf16.msra.mxu0 %v4236_v11  ;;  %3092 = vmatpush3.bf16.msra.mxu1 %v4239_v16 }
 0x589   :  { %3073 = vmatprep.subr.bf16.mxu0 %v4563_v2  ;;  %3093 = vmatprep.subr.bf16.mxu1 %v4563_v2 }
 0x58c   :  { %3074 = vmatpush3.bf16.msra.mxu0 %v4244_v19  ;;  %3094 = vmatpush3.bf16.msra.mxu1 %v4247_v20 }
 0x58d   :  { %3075 = vmatprep.subr.bf16.mxu0 %v4563_v2  ;;  %3095 = vmatprep.subr.bf16.mxu1 %v4563_v2 }
 0x590   :  { %3076 = vmatpush3.bf16.msra.mxu0 %v4252_v22  ;;  %3096 = vmatpush3.bf16.msra.mxu1 %v4255_v23 }
 0x591   :  { %3077 = vmatprep.subr.bf16.mxu0 %v4563_v2  ;;  %3097 = vmatprep.subr.bf16.mxu1 %v4563_v2 }
 0x594   :  { %3078 = vmatpush3.bf16.msra.mxu0 %v4260_v25  ;;  %3098 = vmatpush3.bf16.msra.mxu1 %v4263_v26 }
 0x595   :  { %3103 = vmatprep.subr.bf16.mxu0 %v4563_v2  ;;  %3123 = vmatprep.subr.bf16.mxu1 %v4563_v2 }
 0x597   :  { %3080 = vmatmul.mubr.bf16.vlgmr.msra.gmra.mxu0 %v1580_v5  ;;  %3100 = vmatmul.mubr.bf16.vlgmr.msra.gmra.mxu1 %v1580_v5 }
 0x598   :  { %3104 = vmatpush3.bf16.msra.mxu0 %v4124_v39  ;;  %3124 = vmatpush3.bf16.msra.mxu1 %v4127_v40 }
 0x599   :  { %3105 = vmatprep.subr.bf16.mxu0 %v4563_v2  ;;  %3125 = vmatprep.subr.bf16.mxu1 %v4563_v2 }
 0x59a   :  { %3119 = vmatprep.mubr.msk.bf16.mxu0 %vm3565_vm3, %v4563_v2  ;;  %3139 = vmatprep.mubr.msk.bf16.mxu1 %vm3565_vm3, %v4563_v2 }
 0x59c   :  { %3106 = vmatpush3.bf16.msra.mxu0 %v4136_v42  ;;  %3126 = vmatpush3.bf16.msra.mxu1 %v4139_v43 }
 0x59d   :  { %3107 = vmatprep.subr.bf16.mxu0 %v4563_v2  ;;  %3127 = vmatprep.subr.bf16.mxu1 %v4563_v2 }
 0x5a0   :  { %3108 = vmatpush3.bf16.msra.mxu0 %v4144_v44  ;;  %3128 = vmatpush3.bf16.msra.mxu1 %v4147_v45 }
 0x5a1   :  { %3109 = vmatprep.subr.bf16.mxu0 %v4563_v2  ;;  %3129 = vmatprep.subr.bf16.mxu1 %v4563_v2 }
 0x5a4   :  { %3110 = vmatpush3.bf16.msra.mxu0 %v4152_v46  ;;  %3130 = vmatpush3.bf16.msra.mxu1 %v4155_v47 }
 0x5a5   :  { %3111 = vmatprep.subr.bf16.mxu0 %v4563_v2  ;;  %3131 = vmatprep.subr.bf16.mxu1 %v4563_v2 }
 0x5a8   :  { %3112 = vmatpush3.bf16.msra.mxu0 %v4160_v48  ;;  %3132 = vmatpush3.bf16.msra.mxu1 %v4163_v49 }
 0x5a9   :  { %3113 = vmatprep.subr.bf16.mxu0 %v4563_v2  ;;  %3133 = vmatprep.subr.bf16.mxu1 %v4563_v2 }
 0x5ac   :  { %3114 = vmatpush3.bf16.msra.mxu0 %v4168_v50  ;;  %3134 = vmatpush3.bf16.msra.mxu1 %v4171_v51 }
 0x5ad   :  { %3115 = vmatprep.subr.bf16.mxu0 %v4563_v2  ;;  %3135 = vmatprep.subr.bf16.mxu1 %v4563_v2 }
 0x5b0   :  { %3116 = vmatpush3.bf16.msra.mxu0 %v4176_v52  ;;  %3136 = vmatpush3.bf16.msra.mxu1 %v4179_v53 }
 0x5b1   :  { %3117 = vmatprep.subr.bf16.mxu0 %v4563_v2  ;;  %3137 = vmatprep.subr.bf16.mxu1 %v4563_v2 }
 0x5b4   :  { %3118 = vmatpush3.bf16.msra.mxu0 %v4184_v54  ;;  %3138 = vmatpush3.bf16.msra.mxu1 %v4187_v55 }
 0x5b5   :  { %3143 = vmatprep.subr.bf16.mxu0 %v4563_v2  ;;  %3163 = vmatprep.subr.bf16.mxu1 %v4563_v2 }
 0x637   :  { %v1615_v9 = vpop.f32.mrf.mxu0  ;;  %v1660_v6 = vpop.f32.mrf.mxu1 }
 0x638   :  { %v1666_v62 = vadd.f32 %v1660_v6, %v4572_v13  ;;  %v1621_v8 = vadd.f32 %v1615_v9, %v4573_v18 }
 0x639   :  { %v3041_v59 = vpop.f32.mrf.mxu0  ;;  %v3061_v34 = vpop.f32.mrf.mxu1 }
 0x63a   :  { %v1667_v60 = vmul.f32 0.5, %v1666_v62  ;;  %v1622_v41 = vmul.f32 0.5, %v1621_v8 }
 0x63b   :  { %v1618_v58 = vpop.f32.mrf.mxu0  ;;  %v1663_v17 = vpop.f32.mrf.mxu1 }
 0x63c   :  { %3407 = vtanh.f32 %v1667_v60 }
 0x63d   :  { %v3042_v61 = vpop.f32.mrf.mxu0  ;;  %v3062_v4 = vpop.f32.mrf.mxu1  ;;  %3409 = vtanh.f32 %v1622_v41 }
 0x649   :  { %v3408_v38 = vpop.eup %3407 }
 0x64a   :  { %v3410_v3 = vpop.eup %3409  ;;  %v1669_v5 = vmul.f32 0.5, %v3408_v38 }
 0x64b   :  { %v1624_v6 = vmul.f32 0.5, %v3410_v3 }
 0x64c   :  { %v1670_v59 = vadd.f32 0.5, %v1669_v5 }
 0x64d   :  { %v1625_v34 = vadd.f32 0.5, %v1624_v6 }
 0x64e   :  { %v1758_v17 = vmul.f32 %v1670_v59, %v4309_v36  ;;  %v4578_v36 = vld [vmem:[#allocation28_spill] sm:$0xff] }
 0x657   :  { %v1705_v12 = vpop.f32.mrf.mxu0  ;;  %v1747_v29 = vpop.f32.mrf.mxu1 }
 0x658   :  { %v1711_v28 = vadd.f32 %v1705_v12, %v4574_v27  ;;  %v1753_v37 = vadd.f32 %v1747_v29, %v4575_v35 }
 0x659   :  { %v3081_v30 = vpop.f32.mrf.mxu0  ;;  %v3101_v31 = vpop.f32.mrf.mxu1 }
 0x65a   :  { %3411 = vtanh.f32 %v1711_v28  ;;  %v1754_v9 = vmul.f32 0.5, %v1753_v37  ;;  %v4579_v31 = vld [vmem:[#allocation30_spill] sm:$0xff] }
 0x65b   :  { %v1708_v32 = vpop.f32.mrf.mxu0  ;;  %v1750_v33 = vpop.f32.mrf.mxu1 }
 0x65c   :  { %3413 = vtanh.f32 %v1754_v9 }
 0x65d   :  { %v3082_v21 = vpop.f32.mrf.mxu0  ;;  %v3102_v24 = vpop.f32.mrf.mxu1 }
 0x667   :  { %v3412_v58 = vpop.eup %3411 }
 0x668   :  { %v1759_v61 = vmul.f32 %v3412_v58, %v1625_v34 }
 0x669   :  { %v3414_v13 = vpop.eup %3413 }
 0x66a   :  { %v4389_v4 = vadd.f32 %v1759_v61, %v1758_v17  ;;  %v1756_v62 = vmul.f32 0.5, %v3414_v13 }
 0x66c   :  { %3415 = vtanh.f32 %v4389_v4  ;;  %v1757_v18 = vadd.f32 0.5, %v1756_v62 }
 0x679   :  { %v3416_v8 = vpop.eup %3415 }
 0x67a   :  { %v1762_v60 = vmul.f32 %v3416_v8, %v1757_v18 }
 0x67c   :  { %v1770_v41 = vpack.c.bf16 %v1762_v60, %v1762_v60 }
 0x67e   :  { %3120 = vmatmul.mubr.bf16.vlgmr.msra.gmra.mxu0 %v1770_v41  ;;  %3140 = vmatmul.mubr.bf16.vlgmr.msra.gmra.mxu1 %v1770_v41 }
 0x67f   :  { %3144 = vmatpush3.bf16.msra.mxu0 %v4200_v10  ;;  %3164 = vmatpush3.bf16.msra.mxu1 %v4203_v1 }
 0x680   :  { %3145 = vmatprep.subr.bf16.mxu0 %v4563_v2  ;;  %3165 = vmatprep.subr.bf16.mxu1 %v4563_v2 }
 0x681   :  { %3159 = vmatprep.mubr.msk.bf16.mxu0 %vm3565_vm3, %v4563_v2  ;;  %3179 = vmatprep.mubr.msk.bf16.mxu1 %vm3565_vm3, %v4563_v2 }
 0x683   :  { %3146 = vmatpush3.bf16.msra.mxu0 %v4212_v15  ;;  %3166 = vmatpush3.bf16.msra.mxu1 %v4215_v57 }
 0x684   :  { %3147 = vmatprep.subr.bf16.mxu0 %v4563_v2  ;;  %3167 = vmatprep.subr.bf16.mxu1 %v4563_v2 }
 0x687   :  { %3148 = vmatpush3.bf16.msra.mxu0 %v4220_v7  ;;  %3168 = vmatpush3.bf16.msra.mxu1 %v4223_v14 }
 0x688   :  { %3149 = vmatprep.subr.bf16.mxu0 %v4563_v2  ;;  %3169 = vmatprep.subr.bf16.mxu1 %v4563_v2 }
 0x68b   :  { %3150 = vmatpush3.bf16.msra.mxu0 %v4228_v63  ;;  %3170 = vmatpush3.bf16.msra.mxu1 %v4231_v0 }
 0x68c   :  { %3151 = vmatprep.subr.bf16.mxu0 %v4563_v2  ;;  %3171 = vmatprep.subr.bf16.mxu1 %v4563_v2 }
 0x68f   :  { %3152 = vmatpush3.bf16.msra.mxu0 %v4236_v11  ;;  %3172 = vmatpush3.bf16.msra.mxu1 %v4239_v16 }
 0x690   :  { %3153 = vmatprep.subr.bf16.mxu0 %v4563_v2  ;;  %3173 = vmatprep.subr.bf16.mxu1 %v4563_v2 }
 0x693   :  { %3154 = vmatpush3.bf16.msra.mxu0 %v4244_v19  ;;  %3174 = vmatpush3.bf16.msra.mxu1 %v4247_v20 }
 0x694   :  { %3155 = vmatprep.subr.bf16.mxu0 %v4563_v2  ;;  %3175 = vmatprep.subr.bf16.mxu1 %v4563_v2 }
 0x697   :  { %3156 = vmatpush3.bf16.msra.mxu0 %v4252_v22  ;;  %3176 = vmatpush3.bf16.msra.mxu1 %v4255_v23 }
 0x698   :  { %3157 = vmatprep.subr.bf16.mxu0 %v4563_v2  ;;  %3177 = vmatprep.subr.bf16.mxu1 %v4563_v2 }
 0x69b   :  { %3158 = vmatpush3.bf16.msra.mxu0 %v4260_v25  ;;  %3178 = vmatpush3.bf16.msra.mxu1 %v4263_v26 }
 0x69c   :  { %3183 = vmatprep.subr.bf16.mxu0 %v4563_v2  ;;  %3203 = vmatprep.subr.bf16.mxu1 %v4563_v2 }
 0x69e   :  { %3160 = vmatmul.mubr.bf16.vlgmr.msra.gmra.mxu0 %v1770_v41  ;;  %3180 = vmatmul.mubr.bf16.vlgmr.msra.gmra.mxu1 %v1770_v41 }
 0x69f   :  { %3184 = vmatpush3.bf16.msra.mxu0 %v4124_v39  ;;  %3204 = vmatpush3.bf16.msra.mxu1 %v4127_v40 }
 0x6a0   :  { %3185 = vmatprep.subr.bf16.mxu0 %v4563_v2  ;;  %3205 = vmatprep.subr.bf16.mxu1 %v4563_v2 }
 0x6a1   :  { %3199 = vmatprep.mubr.msk.bf16.mxu0 %vm3565_vm3, %v4563_v2  ;;  %3219 = vmatprep.mubr.msk.bf16.mxu1 %vm3565_vm3, %v4563_v2 }
 0x6a3   :  { %3186 = vmatpush3.bf16.msra.mxu0 %v4136_v42  ;;  %3206 = vmatpush3.bf16.msra.mxu1 %v4139_v43 }
 0x6a4   :  { %3187 = vmatprep.subr.bf16.mxu0 %v4563_v2  ;;  %3207 = vmatprep.subr.bf16.mxu1 %v4563_v2 }
 0x6a7   :  { %3188 = vmatpush3.bf16.msra.mxu0 %v4144_v44  ;;  %3208 = vmatpush3.bf16.msra.mxu1 %v4147_v45 }
 0x6a8   :  { %3189 = vmatprep.subr.bf16.mxu0 %v4563_v2  ;;  %3209 = vmatprep.subr.bf16.mxu1 %v4563_v2 }
 0x6ab   :  { %3190 = vmatpush3.bf16.msra.mxu0 %v4152_v46  ;;  %3210 = vmatpush3.bf16.msra.mxu1 %v4155_v47 }
 0x6ac   :  { %3191 = vmatprep.subr.bf16.mxu0 %v4563_v2  ;;  %3211 = vmatprep.subr.bf16.mxu1 %v4563_v2 }
 0x6af   :  { %3192 = vmatpush3.bf16.msra.mxu0 %v4160_v48  ;;  %3212 = vmatpush3.bf16.msra.mxu1 %v4163_v49  ;;  %v4576_v48 = vld [vmem:[#allocation29_spill] sm:$0xff] }
 0x6b0   :  { %3193 = vmatprep.subr.bf16.mxu0 %v4563_v2  ;;  %3213 = vmatprep.subr.bf16.mxu1 %v4563_v2 }
 0x6b3   :  { %3194 = vmatpush3.bf16.msra.mxu0 %v4168_v50  ;;  %3214 = vmatpush3.bf16.msra.mxu1 %v4171_v51  ;;  %v4577_v50 = vld [vmem:[#allocation27_spill] sm:$0xff] }
 0x6b4   :  { %3195 = vmatprep.subr.bf16.mxu0 %v4563_v2  ;;  %3215 = vmatprep.subr.bf16.mxu1 %v4563_v2 }
 0x6b7   :  { %3196 = vmatpush3.bf16.msra.mxu0 %v4176_v52  ;;  %3216 = vmatpush3.bf16.msra.mxu1 %v4179_v53 }
 0x6b8   :  { %3197 = vmatprep.subr.bf16.mxu0 %v4563_v2  ;;  %3217 = vmatprep.subr.bf16.mxu1 %v4563_v2 }
 0x6bb   :  { %3198 = vmatpush3.bf16.msra.mxu0 %v4184_v54  ;;  %3218 = vmatpush3.bf16.msra.mxu1 %v4187_v55 }
 0x6bc   :  { %3223 = vmatprep.subr.bf16.mxu0 %v4563_v2  ;;  %3243 = vmatprep.subr.bf16.mxu1 %v4563_v2 }
 0x73e   :  { %v1805_v39 = vpop.f32.mrf.mxu0  ;;  %v1850_v40 = vpop.f32.mrf.mxu1 }
 0x73f   :  { %v1856_v49 = vadd.f32 %v1850_v40, %v4576_v48  ;;  %v1811_v51 = vadd.f32 %v1805_v39, %v4577_v50 }
 0x740   :  { %v3121_v42 = vpop.f32.mrf.mxu0  ;;  %v3141_v43 = vpop.f32.mrf.mxu1 }
 0x741   :  { %v1857_v52 = vmul.f32 0.5, %v1856_v49  ;;  %v1812_v53 = vmul.f32 0.5, %v1811_v51 }
 0x742   :  { %v1808_v44 = vpop.f32.mrf.mxu0  ;;  %v1853_v45 = vpop.f32.mrf.mxu1 }
 0x743   :  { %3417 = vtanh.f32 %v1857_v52  ;;  %v4580_v45 = vld [vmem:[#allocation33_spill] sm:$0xff] }
 0x744   :  { %v3122_v46 = vpop.f32.mrf.mxu0  ;;  %v3142_v47 = vpop.f32.mrf.mxu1  ;;  %3419 = vtanh.f32 %v1812_v53 }
 0x745   :  { %v4581_v47 = vld [vmem:[#allocation31_spill] sm:$0xff] }
 0x750   :  { %v3418_v33 = vpop.eup %3417 }
 0x751   :  { %v3420_v38 = vpop.eup %3419  ;;  %v1859_v21 = vmul.f32 0.5, %v3418_v33 }
 0x752   :  { %v1814_v3 = vmul.f32 0.5, %v3420_v38 }
 0x753   :  { %v1860_v5 = vadd.f32 0.5, %v1859_v21 }
 0x754   :  { %v1815_v9 = vadd.f32 0.5, %v1814_v3 }
 0x755   :  { %v1948_v59 = vmul.f32 %v1860_v5, %v4389_v4 }
 0x75e   :  { %v1895_v54 = vpop.f32.mrf.mxu0  ;;  %v1937_v55 = vpop.f32.mrf.mxu1 }
 0x75f   :  { %v1901_v12 = vadd.f32 %v1895_v54, %v4578_v36  ;;  %v1943_v32 = vadd.f32 %v1937_v55, %v4579_v31 }
 0x760   :  { %v3161_v29 = vpop.f32.mrf.mxu0  ;;  %v3181_v27 = vpop.f32.mrf.mxu1 }
 0x761   :  { %3421 = vtanh.f32 %v1901_v12  ;;  %v1944_v24 = vmul.f32 0.5, %v1943_v32 }
 0x762   :  { %v1898_v28 = vpop.f32.mrf.mxu0  ;;  %v1940_v30 = vpop.f32.mrf.mxu1 }
 0x763   :  { %3423 = vtanh.f32 %v1944_v24 }
 0x764   :  { %v3162_v35 = vpop.f32.mrf.mxu0  ;;  %v3182_v37 = vpop.f32.mrf.mxu1 }
 0x76e   :  { %v3422_v6 = vpop.eup %3421 }
 0x76f   :  { %v1949_v34 = vmul.f32 %v3422_v6, %v1815_v9 }
 0x770   :  { %v3424_v17 = vpop.eup %3423 }
 0x771   :  { %v4469_v58 = vadd.f32 %v1949_v34, %v1948_v59  ;;  %v1946_v61 = vmul.f32 0.5, %v3424_v17  ;;  %v2317_v17 = vld [vmem:[%s4540_s5] ss:$0 sm:$0xff] }
 0x773   :  { %3425 = vtanh.f32 %v4469_v58  ;;  %v1947_v13 = vadd.f32 0.5, %v1946_v61 }
 0x780   :  { %v3426_v62 = vpop.eup %3425 }
 0x781   :  { %v1952_v18 = vmul.f32 %v3426_v62, %v1947_v13 }
 0x783   :  { %v1960_v8 = vpack.c.bf16 %v1952_v18, %v1952_v18 }
 0x785   :  { %3200 = vmatmul.mubr.bf16.vlgmr.msra.gmra.mxu0 %v1960_v8  ;;  %3220 = vmatmul.mubr.bf16.vlgmr.msra.gmra.mxu1 %v1960_v8 }
 0x786   :  { %3224 = vmatpush3.bf16.msra.mxu0 %v4200_v10  ;;  %3244 = vmatpush3.bf16.msra.mxu1 %v4203_v1  ;;  %v2163_v10 = vld [vmem:[#allocation10 + $0x78] sm:$0xff]  ;;  %v2162_v1 = vld [vmem:[#allocation10 + $0x70] sm:$0xff] }
 0x787   :  { %3225 = vmatprep.subr.bf16.mxu0 %v4563_v2  ;;  %3245 = vmatprep.subr.bf16.mxu1 %v4563_v2 }
 0x788   :  { %3239 = vmatprep.mubr.msk.bf16.mxu0 %vm3565_vm3, %v4563_v2  ;;  %3259 = vmatprep.mubr.msk.bf16.mxu1 %vm3565_vm3, %v4563_v2 }
 0x78a   :  { %3226 = vmatpush3.bf16.msra.mxu0 %v4212_v15  ;;  %3246 = vmatpush3.bf16.msra.mxu1 %v4215_v57  ;;  %v2161_v15 = vld [vmem:[#allocation10 + $0x68] sm:$0xff]  ;;  %v2160_v57 = vld [vmem:[#allocation10 + $0x60] sm:$0xff] }
 0x78b   :  { %3227 = vmatprep.subr.bf16.mxu0 %v4563_v2  ;;  %3247 = vmatprep.subr.bf16.mxu1 %v4563_v2 }
 0x78e   :  { %3228 = vmatpush3.bf16.msra.mxu0 %v4220_v7  ;;  %3248 = vmatpush3.bf16.msra.mxu1 %v4223_v14  ;;  %v2159_v7 = vld [vmem:[#allocation10 + $0x58] sm:$0xff]  ;;  %v2158_v14 = vld [vmem:[#allocation10 + $0x50] sm:$0xff] }
 0x78f   :  { %3229 = vmatprep.subr.bf16.mxu0 %v4563_v2  ;;  %3249 = vmatprep.subr.bf16.mxu1 %v4563_v2 }
 0x792   :  { %3230 = vmatpush3.bf16.msra.mxu0 %v4228_v63  ;;  %3250 = vmatpush3.bf16.msra.mxu1 %v4231_v0  ;;  %v2157_v63 = vld [vmem:[#allocation10 + $0x48] sm:$0xff]  ;;  %v2156_v0 = vld [vmem:[#allocation10 + $0x40] sm:$0xff] }
 0x793   :  { %3231 = vmatprep.subr.bf16.mxu0 %v4563_v2  ;;  %3251 = vmatprep.subr.bf16.mxu1 %v4563_v2 }
 0x796   :  { %3232 = vmatpush3.bf16.msra.mxu0 %v4236_v11  ;;  %3252 = vmatpush3.bf16.msra.mxu1 %v4239_v16  ;;  %v2155_v11 = vld [vmem:[#allocation10 + $0x38] sm:$0xff]  ;;  %v2154_v16 = vld [vmem:[#allocation10 + $0x30] sm:$0xff] }
 0x797   :  { %3233 = vmatprep.subr.bf16.mxu0 %v4563_v2  ;;  %3253 = vmatprep.subr.bf16.mxu1 %v4563_v2 }
 0x79a   :  { %3234 = vmatpush3.bf16.msra.mxu0 %v4244_v19  ;;  %3254 = vmatpush3.bf16.msra.mxu1 %v4247_v20  ;;  %v2153_v19 = vld [vmem:[#allocation10 + $0x28] sm:$0xff]  ;;  %v2152_v20 = vld [vmem:[#allocation10 + $0x20] sm:$0xff] }
 0x79b   :  { %3235 = vmatprep.subr.bf16.mxu0 %v4563_v2  ;;  %3255 = vmatprep.subr.bf16.mxu1 %v4563_v2 }
 0x79e   :  { %3236 = vmatpush3.bf16.msra.mxu0 %v4252_v22  ;;  %3256 = vmatpush3.bf16.msra.mxu1 %v4255_v23  ;;  %v2151_v22 = vld [vmem:[#allocation10 + $0x18] sm:$0xff]  ;;  %v2150_v23 = vld [vmem:[#allocation10 + $0x10] sm:$0xff] }
 0x79f   :  { %3237 = vmatprep.subr.bf16.mxu0 %v4563_v2  ;;  %3257 = vmatprep.subr.bf16.mxu1 %v4563_v2 }
 0x7a2   :  { %3238 = vmatpush3.bf16.msra.mxu0 %v4260_v25  ;;  %3258 = vmatpush3.bf16.msra.mxu1 %v4263_v26  ;;  %v2149_v25 = vld [vmem:[#allocation10 + $0x8] sm:$0xff]  ;;  %v2148_v26 = vld [vmem:[#allocation10] sm:$0xff] }
 0x7a3   :  { %3263 = vmatprep.subr.mxu0 %v4563_v2 }
 0x7a5   :  { %3240 = vmatmul.mubr.bf16.vlgmr.msra.gmra.mxu0 %v1960_v8  ;;  %3260 = vmatmul.mubr.bf16.vlgmr.msra.gmra.mxu1 %v1960_v8 }
 0x7a6   :  { %3295 = vmatprep.mubr.msk.f32.mxu0 %vm3565_vm3, %v4563_v2  ;;  %3264 = vmatpush3.msra.mxu0 %v2163_v10 }
 0x7a7   :  { %3265 = vmatprep.subr.mxu0 %v4563_v2 }
 0x7a8   :  { %3266 = vmatpush3.msra.mxu0 %v2162_v1 }
 0x7a9   :  { %3267 = vmatprep.subr.mxu0 %v4563_v2 }
 0x7aa   :  { %3268 = vmatpush3.msra.mxu0 %v2161_v15 }
 0x7ab   :  { %3269 = vmatprep.subr.mxu0 %v4563_v2 }
 0x7ac   :  { %3270 = vmatpush3.msra.mxu0 %v2160_v57 }
 0x7ad   :  { %3271 = vmatprep.subr.mxu0 %v4563_v2 }
 0x7ae   :  { %3272 = vmatpush3.msra.mxu0 %v2159_v7 }
 0x7af   :  { %3273 = vmatprep.subr.mxu0 %v4563_v2 }
 0x7b0   :  { %3274 = vmatpush3.msra.mxu0 %v2158_v14 }
 0x7b1   :  { %3275 = vmatprep.subr.mxu0 %v4563_v2 }
 0x7b2   :  { %3276 = vmatpush3.msra.mxu0 %v2157_v63 }
 0x7b3   :  { %3277 = vmatprep.subr.mxu0 %v4563_v2 }
 0x7b4   :  { %3278 = vmatpush3.msra.mxu0 %v2156_v0 }
 0x7b5   :  { %3279 = vmatprep.subr.mxu0 %v4563_v2 }
 0x7b6   :  { %3280 = vmatpush3.msra.mxu0 %v2155_v11 }
 0x7b7   :  { %3281 = vmatprep.subr.mxu0 %v4563_v2 }
 0x7b8   :  { %3282 = vmatpush3.msra.mxu0 %v2154_v16 }
 0x7b9   :  { %3283 = vmatprep.subr.mxu0 %v4563_v2 }
 0x7ba   :  { %3284 = vmatpush3.msra.mxu0 %v2153_v19 }
 0x7bb   :  { %3285 = vmatprep.subr.mxu0 %v4563_v2 }
 0x7bc   :  { %3286 = vmatpush3.msra.mxu0 %v2152_v20 }
 0x7bd   :  { %3287 = vmatprep.subr.mxu0 %v4563_v2 }
 0x7be   :  { %3288 = vmatpush3.msra.mxu0 %v2151_v22 }
 0x7bf   :  { %3289 = vmatprep.subr.mxu0 %v4563_v2 }
 0x7c0   :  { %3290 = vmatpush3.msra.mxu0 %v2150_v23 }
 0x7c1   :  { %3291 = vmatprep.subr.mxu0 %v4563_v2 }
 0x7c2   :  { %3292 = vmatpush3.msra.mxu0 %v2149_v25 }
 0x7c3   :  { %3293 = vmatprep.subr.mxu0 %v4563_v2  ;;  %v4582_v2 = vld [vmem:[#allocation32_spill] sm:$0xff] }
 0x7c4   :  { %3294 = vmatpush3.msra.mxu0 %v2148_v26 }
 0x845   :  { %v1995_v4 = vpop.f32.mrf.mxu0  ;;  %v2040_v60 = vpop.f32.mrf.mxu1 }
 0x846   :  { %v2046_v46 = vadd.f32 %v2040_v60, %v4580_v45  ;;  %v2001_v48 = vadd.f32 %v1995_v4, %v4581_v47 }
 0x847   :  { %v3201_v41 = vpop.f32.mrf.mxu0  ;;  %v3221_v39 = vpop.f32.mrf.mxu1 }
 0x848   :  { %v2047_v49 = vmul.f32 0.5, %v2046_v46  ;;  %v2002_v50 = vmul.f32 0.5, %v2001_v48 }
 0x849   :  { %v1998_v40 = vpop.f32.mrf.mxu0  ;;  %v2043_v42 = vpop.f32.mrf.mxu1 }
 0x84a   :  { %3427 = vtanh.f32 %v2047_v49 }
 0x84b   :  { %v3202_v43 = vpop.f32.mrf.mxu0  ;;  %v3222_v44 = vpop.f32.mrf.mxu1  ;;  %3429 = vtanh.f32 %v2002_v50 }
 0x857   :  { %v3428_v27 = vpop.eup %3427 }
 0x858   :  { %v3430_v31 = vpop.eup %3429  ;;  %v2049_v32 = vmul.f32 0.5, %v3428_v27 }
 0x859   :  { %v2004_v35 = vmul.f32 0.5, %v3430_v31 }
 0x85a   :  { %v2050_v37 = vadd.f32 0.5, %v2049_v32 }
 0x85b   :  { %v2005_v38 = vadd.f32 0.5, %v2004_v35 }
 0x85c   :  { %v2138_v24 = vmul.f32 %v2050_v37, %v4469_v58 }
 0x865   :  { %v2085_v51 = vpop.f32.mrf.mxu0  ;;  %v2127_v52 = vpop.f32.mrf.mxu1 }
 0x866   :  { %v2091_v53 = vadd.f32 %v2085_v51, %v4582_v2  ;;  %v2133_v29 = vadd.f32 %v2127_v52, %v3915_v56 }
 0x867   :  { %v3241_v54 = vpop.f32.mrf.mxu0  ;;  %v3261_v55 = vpop.f32.mrf.mxu1 }
 0x868   :  { %3431 = vtanh.f32 %v2091_v53  ;;  %v2134_v33 = vmul.f32 0.5, %v2133_v29 }
 0x869   :  { %v2088_v36 = vpop.f32.mrf.mxu0  ;;  %v2130_v12 = vpop.f32.mrf.mxu1 }
 0x86a   :  { %3433 = vtanh.f32 %v2134_v33 }
 0x86b   :  { %v3242_v28 = vpop.f32.mrf.mxu0  ;;  %v3262_v30 = vpop.f32.mrf.mxu1 }
 0x875   :  { %v3432_v21 = vpop.eup %3431 }
 0x876   :  { %v2139_v3 = vmul.f32 %v3432_v21, %v2005_v38 }
 0x877   :  { %v3434_v9 = vpop.eup %3433 }
 0x878   :  { %v2140_v5 = vadd.f32 %v2139_v3, %v2138_v24  ;;  %v2136_v6 = vmul.f32 0.5, %v3434_v9 }
 0x87a   :  { %3435 = vtanh.f32 %v2140_v5  ;;  %v2137_v59 = vadd.f32 0.5, %v2136_v6 }
 0x887   :  { %v3436_v56 = vpop.eup %3435 }
 0x888   :  { %v2142_v34 = vmul.f32 %v3436_v56, %v2137_v59 }
 0x88a   :  { %3296 = vmatmul.mubr.f32.vlgmr.msra.gmra.mxu0 %v2142_v34 }
 0x94a   :  { %v2237_v61 = vpop.f32.mrf.mxu0 }
 0x94b   :  { %v2238_v13 = vadd.f32 %v2317_v17, %v2237_v61 }
 0x94c   :  { %v3297_v62 = vpop.f32.mrf.mxu0 }
 0x94d   :  { %2241 = vst [vmem:[#allocation11] sm:$0xff] %v2238_v13 }
 0x94e   :  { %3540 = shalt.err (!%p3537_p5)
}
 0x94f   :  { %2251 = dma.vmem_to_hbm [thread:$0]  %s2249_s24, 128, %s4541_s6, [#allocation7]  }
 0x950   :  { %3553 = dma.done.wait [#allocation7], 128  }
 0x951   :  { %3554 = vsyncadd [#allocation7], 4294967168 }
 0x952   :  { %2255 = vsyncpa [#allocation6], 1 }
 0x953   :  { %2256 = vsyncpa [#allocation9], 1 }
 0x954   :  { %2257 = vsyncpa [#allocation7], 1 }

</bundles_post_ra>
